<compile_context>
chip_gen: v7x
topology: tpu7x:2x2x1
jax: 0.10.0
libtpu: 0.0.40
codegen_flags: <defaults>
</compile_context>

<pallas_src>
import functools
import math

import jax
import jax.numpy as jnp
from jax import lax
from jax.experimental import pallas as pl
from jax.experimental.pallas import tpu as pltpu

MXU_DTYPE = jnp.bfloat16  # bf16 MXU inputs + f32 accumulation (fast on v5e/v6e/v7x)


def _mm(a, b):
    """2-D matmul on the MXU, f32 accumulation."""
    return jnp.dot(a.astype(MXU_DTYPE), b.astype(MXU_DTYPE),
                   preferred_element_type=jnp.float32)


def _bmm(spec, a, b):
    """Sequence-batched matmul on the MXU, f32 accumulation."""
    return jnp.einsum(spec, a.astype(MXU_DTYPE), b.astype(MXU_DTYPE),
                      preferred_element_type=jnp.float32)


def _layer_norm(x, g, b, eps=1e-5):
    mu = jnp.mean(x, axis=-1, keepdims=True)
    var = jnp.mean((x - mu) * (x - mu), axis=-1, keepdims=True)
    return (x - mu) * lax.rsqrt(var + eps) * g + b


# ---------------------------------------------------------------------------
# Kernel 1: embedding lookup as a scalar-prefetch row gather.
# The table stays in HBM; the data-dependent index_map DMAs one selected row
# per grid step (O(BS*D) traffic instead of a BSxVxD one-hot matmul).
# ---------------------------------------------------------------------------
def embed_gather_kernel(tok_ref, emb_row_ref, out_ref):
    del tok_ref  # only consumed by the index_map
    out_ref[...] = emb_row_ref[...]


def embedding_lookup(tokens, emb):
    B, S = tokens.shape
    V, D = emb.shape
    BS = B * S
    tok = tokens.reshape(BS).astype(jnp.int32)
    emb3 = emb.reshape(V, 1, D)                       # free HBM-side reshape
    out = pl.pallas_call(
        embed_gather_kernel,
        out_shape=jax.ShapeDtypeStruct((BS, 1, D), emb.dtype),
        grid_spec=pltpu.PrefetchScalarGridSpec(
            num_scalar_prefetch=1,
            grid=(BS,),
            in_specs=[pl.BlockSpec((1, 1, D), lambda i, tok: (tok[i], 0, 0))],
            out_specs=pl.BlockSpec((1, 1, D), lambda i, tok: (i, 0, 0)),
        ),
        compiler_params=pltpu.CompilerParams(
            dimension_semantics=("arbitrary",)),
    )(tok, emb3)
    return out.reshape(B, S, D)


# ---------------------------------------------------------------------------
# Kernel 2: layer-streamed encoder stack + mean pool + classifier.
# Grid = (batch_shards ["parallel"], num_layers ["arbitrary"]).  Per-layer
# weights are streamed (double-buffered) by BlockSpec; the activation for the
# current batch shard persists in a VMEM scratch across the layer axis.
# ---------------------------------------------------------------------------
def encoder_kernel(x_ref, wqkv_ref, bqkv_ref, wo_ref, bo_ref,
                   g1_ref, b1_ref, w1_ref, fb1_ref, w2_ref, fb2_ref,
                   g2_ref, b2_ref, fcw_ref, fcb_ref,
                   o_ref, x_sc, *, nhead):
    Bs, S, D = x_ref.shape
    BS = Bs * S
    H = nhead
    dh = D // H
    scale = 1.0 / math.sqrt(dh)
    l = pl.program_id(1)

    # Layer 0: load this batch shard's embeddings into the persistent scratch.
    @pl.when(l == 0)
    def _():
        x_sc[...] = x_ref[...].reshape(BS, D).astype(jnp.float32)

    x = x_sc[...]                                       # (BS, D) f32, resident

    wqkv = wqkv_ref[0]; bqkv = bqkv_ref[0]              # (D, 3D), (1, 3D)
    wo = wo_ref[0];     bo = bo_ref[0]                  # (D, D), (1, D)
    g1 = g1_ref[0];     b1 = b1_ref[0]
    w1 = w1_ref[0];     fb1 = fb1_ref[0]                # (D, F), (1, F)
    w2 = w2_ref[0];     fb2 = fb2_ref[0]                # (F, D), (1, D)
    g2 = g2_ref[0];     b2 = b2_ref[0]

    # --- fused QKV projection: one full-D-contraction, 3D-wide matmul ---
    qkv = _mm(x, wqkv) + bqkv                           # (BS, 3D) f32

    # --- attention: sequence-batched einsums, small static head loop ---
    ctx_heads = []
    for h in range(H):
        qh = qkv[:, h * dh:(h + 1) * dh].reshape(Bs, S, dh)
        kh = qkv[:, D + h * dh:D + (h + 1) * dh].reshape(Bs, S, dh)
        vh = qkv[:, 2 * D + h * dh:2 * D + (h + 1) * dh].reshape(Bs, S, dh)
        s = _bmm('bqd,bkd->bqk', qh, kh) * scale        # (Bs, S, S)
        s = s - jnp.max(s, axis=-1, keepdims=True)
        p = jnp.exp(s)
        p = p * pl.reciprocal(jnp.sum(p, axis=-1, keepdims=True), approx=True)
        ctx_heads.append(_bmm('bqk,bkd->bqd', p, vh).reshape(BS, dh))
    ctx = jnp.concatenate(ctx_heads, axis=-1)           # (BS, D) head merge

    # --- output projection: single full-D contraction ---
    attn = _mm(ctx, wo) + bo

    # --- residual + LayerNorm 1 (post-norm, norm_first=False) ---
    x = _layer_norm(x + attn, g1, b1)

    # --- feed-forward: Linear -> ReLU -> Linear ---
    # TODO(synk): dropout inside the encoder layer is eval-mode identity.
    h1 = jnp.maximum(_mm(x, w1) + fb1, 0.0)             # (BS, F)
    ff = _mm(h1, w2) + fb2                               # (BS, D)

    # --- residual + LayerNorm 2 ---
    x = _layer_norm(x + ff, g2, b2)
    x_sc[...] = x

    # --- last layer: f32 mean over seq + classifier head ---
    @pl.when(l == pl.num_programs(1) - 1)
    def _():
        pooled = jnp.sum(x.reshape(Bs, S, D), axis=1) * jnp.float32(1.0 / S)
        logits = _mm(pooled, fcw_ref[...]) + fcb_ref[...]      # (Bs, C)
        o_ref[...] = logits.reshape(Bs, 1, -1).astype(o_ref.dtype)


def transformer_model_forward(tokens, kp, *, nhead, batch_splits=None):
    B, S = tokens.shape
    V, D = kp["emb"].shape
    L = kp["wqkv"].shape[0]
    F = kp["w1"].shape[-1]
    C = kp["fcw"].shape[-1]
    assert D % nhead == 0, "d_model must be divisible by nhead"

    if batch_splits is None:
        batch_splits = 2 if B % 2 == 0 else 1   # shard work over v7x's 2 TCs
    NB = batch_splits
    assert B % NB == 0
    Bs = B // NB

    # Stage 1: embedding gather (guard out-of-range ids by clamping).
    x_emb = embedding_lookup(jnp.clip(tokens, 0, V - 1), kp["emb"])  # (B,S,D)

    # Stage 2: layer-streamed encoder + pool + classifier.
    def wspec(shape):
        return pl.BlockSpec((1,) + shape, lambda b, l: (l,) + (0,) * len(shape))

    in_specs = [
        pl.BlockSpec((Bs, S, D), lambda b, l: (b, 0, 0)),   # x_emb (per-shard)
        wspec((D, 3 * D)),                                  # wqkv
        wspec((1, 3 * D)),                                  # bqkv
        wspec((D, D)),                                      # wo
        wspec((1, D)),                                      # bo
        wspec((1, D)),                                      # g1
        wspec((1, D)),                                      # b1
        wspec((D, F)),                                      # w1
        wspec((1, F)),                                      # fb1
        wspec((F, D)),                                      # w2
        wspec((1, D)),                                      # fb2
        wspec((1, D)),                                      # g2
        wspec((1, D)),                                      # b2
        pl.BlockSpec((D, C), lambda b, l: (0, 0)),          # fcw (resident)
        pl.BlockSpec((1, C), lambda b, l: (0, 0)),          # fcb (resident)
    ]
    args = (x_emb, kp["wqkv"], kp["bqkv"], kp["wo"], kp["bo"],
            kp["g1"], kp["b1"], kp["w1"], kp["fb1"], kp["w2"], kp["fb2"],
            kp["g2"], kp["b2"], kp["fcw"], kp["fcb"])

    # Explicit VMEM budget: 2x (one layer's streamed weights) + activations
    # + headroom; clamped so it stays within v7x's 64 MiB physical VMEM.
    per_layer_w = (D * 3 * D + 3 * D + D * D + D + 4 * D
                   + D * F + F + F * D + D)
    est = 4 * (2 * per_layer_w + 4 * Bs * S * D + Bs * S * 3 * D + D * C + C)
    vmem_limit = int(min(max(2 * est + (4 << 20), 16 << 20), 48 << 20))

    out = pl.pallas_call(
        functools.partial(encoder_kernel, nhead=nhead),
        out_shape=jax.ShapeDtypeStruct((B, 1, C), jnp.float32),
        grid=(NB, L),
        in_specs=in_specs,
        out_specs=pl.BlockSpec((Bs, 1, C), lambda b, l: (b, 0, 0)),
        scratch_shapes=[pltpu.VMEM((Bs * S, D), jnp.float32)],
        compiler_params=pltpu.CompilerParams(
            dimension_semantics=("parallel", "arbitrary"),
            vmem_limit_bytes=vmem_limit),
    )(*args)
    return out.reshape(B, C)


# ---------------------------------------------------------------------------
# Parameters: generated in PyTorch layout, then re-laid-out for the kernel.
# ---------------------------------------------------------------------------
def init_params(key, vocab_size, d_model, nhead, num_layers, hidden_dim,
                num_classes):
    """PyTorch-style shapes (Linear weights are (out_features, in_features))."""
    def nrm(k, shape, std=0.02):
        return jax.random.normal(k, shape, jnp.float32) * std

    keys = iter(jax.random.split(key, 3 + 8 * num_layers))
    params = {
        "embedding": nrm(next(keys), (vocab_size, d_model)),
        "fc_w": nrm(next(keys), (num_classes, d_model)),
        "fc_b": nrm(next(keys), (num_classes,)),
        "layers": [],
    }
    for _ in range(num_layers):
        params["layers"].append({
            "in_proj_w": nrm(next(keys), (3 * d_model, d_model)),
            "in_proj_b": nrm(next(keys), (3 * d_model,)),
            "out_proj_w": nrm(next(keys), (d_model, d_model)),
            "out_proj_b": nrm(next(keys), (d_model,)),
            "ln1_g": jnp.ones((d_model,), jnp.float32),
            "ln1_b": jnp.zeros((d_model,), jnp.float32),
            "lin1_w": nrm(next(keys), (hidden_dim, d_model)),
            "lin1_b": nrm(next(keys), (hidden_dim,)),
            "lin2_w": nrm(next(keys), (d_model, hidden_dim)),
            "lin2_b": nrm(next(keys), (d_model,)),
            "ln2_g": jnp.ones((d_model,), jnp.float32),
            "ln2_b": jnp.zeros((d_model,), jnp.float32),
        })
    return params


def prepare_params(params, nhead):
    """Free HBM-side layout plumbing:
      * Linear weights -> (in, out) so the kernel does x @ W directly.
      * QKV weights kept as one fused (D, 3D) slab (full-D contraction).
      * Per-layer tensors stacked along a leading num_layers axis so they can
        be streamed layer-by-layer over the grid."""
    emb = params["embedding"]
    V, D = emb.shape
    assert D % nhead == 0

    def per_layer(p):
        return {
            "wqkv": p["in_proj_w"].T,                    # (D, 3D)
            "bqkv": p["in_proj_b"].reshape(1, 3 * D),
            "wo": p["out_proj_w"].T,                     # (D, D)
            "bo": p["out_proj_b"].reshape(1, D),
            "g1": p["ln1_g"].reshape(1, D), "b1": p["ln1_b"].reshape(1, D),
            "w1": p["lin1_w"].T, "fb1": p["lin1_b"].reshape(1, -1),
            "w2": p["lin2_w"].T, "fb2": p["lin2_b"].reshape(1, D),
            "g2": p["ln2_g"].reshape(1, D), "b2": p["ln2_b"].reshape(1, D),
        }

    layers = [per_layer(p) for p in params["layers"]]
    stacked = {k: jnp.stack([lp[k] for lp in layers], axis=0) for k in layers[0]}
    stacked["emb"] = emb                                  # (V, D), stays in HBM
    stacked["fcw"] = params["fc_w"].T                     # (D, C)
    stacked["fcb"] = params["fc_b"].reshape(1, -1)        # (1, C)
    return stacked


if __name__ == "__main__":
    vocab_size = 100
    d_model = 32
    nhead = 4
    num_encoder_layers = 2
    hidden_dim = 64
    num_classes = 3
    B, S = 2, 8

    key = jax.random.PRNGKey(0)
    k_tok, k_par = jax.random.split(key)
    tokens = jax.random.randint(k_tok, (B, S), 0, vocab_size, dtype=jnp.int32)
    params = init_params(k_par, vocab_size, d_model, nhead,
                         num_encoder_layers, hidden_dim, num_classes)
    kparams = prepare_params(params, nhead)

    fwd = jax.jit(functools.partial(transformer_model_forward, nhead=nhead))
    out = fwd(tokens, kparams)
    out = jax.block_until_ready(out)
    assert out.shape == (B, num_classes)
    assert bool(jnp.all(jnp.isfinite(out)))
    print("KERNEL_OK")
</pallas_src>

<mosaic_0001>
module attributes {stable_mosaic.version = 11 : i64} {
  func.func @embed_gather_kernel(%arg0: i32, %arg1: memref<16xi32, #tpu.memory_space<smem>>, %arg2: memref<1x1x32xf32, #tpu.memory_space<vmem>>, %arg3: memref<1x1x32xf32, #tpu.memory_space<vmem>>) attributes {dimension_semantics = [#tpu.dimension_semantics<arbitrary>], iteration_bounds = array<i64: 16>, scalar_prefetch = 1 : i64, scratch_operands = 0 : i64, tpu.core_type = #tpu.core_type<tc>, window_params = [{transform_indices = @transform_0, window_bounds = array<i64: 1, 1, 32>}, {transform_indices = @transform_1, window_bounds = array<i64: 1, 1, 32>}]} {
    %c0 = arith.constant 0 : index
    %c0_0 = arith.constant 0 : index
    %c0_1 = arith.constant 0 : index
    %0 = vector.load %arg2[%c0, %c0_0, %c0_1] : memref<1x1x32xf32, #tpu.memory_space<vmem>>, vector<1x1x32xf32>
    %c0_2 = arith.constant 0 : index
    %c0_3 = arith.constant 0 : index
    %c0_4 = arith.constant 0 : index
    %1 = vector.load %arg3[%c0_2, %c0_3, %c0_4] : memref<1x1x32xf32, #tpu.memory_space<vmem>>, vector<1x1x32xf32>
    tpu.vector_store %arg3[%c0_2, %c0_3, %c0_4], %0 {strides = array<i32>} : memref<1x1x32xf32, #tpu.memory_space<vmem>>, vector<1x1x32xf32>,
    return
  }
  func.func @transform_0(%arg0: i32, %arg1: memref<16xi32, #tpu.memory_space<smem>>) -> (i32, i32, i32) {
    %0 = arith.index_cast %arg0 : i32 to index
    %1 = memref.load %arg1[%0] : memref<16xi32, #tpu.memory_space<smem>>
    %c0_i32 = arith.constant 0 : i32
    %c0_i32_0 = arith.constant 0 : i32
    %c0_i32_1 = arith.constant 0 : i32
    return %1, %c0_i32, %c0_i32_0 : i32, i32, i32
  }
  func.func @transform_1(%arg0: i32, %arg1: memref<16xi32, #tpu.memory_space<smem>>) -> (i32, i32, i32) {
    %c0_i32 = arith.constant 0 : i32
    %c0_i32_0 = arith.constant 0 : i32
    %c0_i32_1 = arith.constant 0 : i32
    return %arg0, %c0_i32, %c0_i32_0 : i32, i32, i32
  }
}

module attributes {stable_mosaic.version = 11 : i64} {
  func.func @encoder_kernel(%arg0: i32, %arg1: i32, %arg2: memref<1x8x32xf32, #tpu.memory_space<vmem>>, %arg3: memref<1x32x96xf32, #tpu.memory_space<vmem>>, %arg4: memref<1x1x96xf32, #tpu.memory_space<vmem>>, %arg5: memref<1x32x32xf32, #tpu.memory_space<vmem>>, %arg6: memref<1x1x32xf32, #tpu.memory_space<vmem>>, %arg7: memref<1x1x32xf32, #tpu.memory_space<vmem>>, %arg8: memref<1x1x32xf32, #tpu.memory_space<vmem>>, %arg9: memref<1x32x64xf32, #tpu.memory_space<vmem>>, %arg10: memref<1x1x64xf32, #tpu.memory_space<vmem>>, %arg11: memref<1x64x32xf32, #tpu.memory_space<vmem>>, %arg12: memref<1x1x32xf32, #tpu.memory_space<vmem>>, %arg13: memref<1x1x32xf32, #tpu.memory_space<vmem>>, %arg14: memref<1x1x32xf32, #tpu.memory_space<vmem>>, %arg15: memref<32x3xf32, #tpu.memory_space<vmem>>, %arg16: memref<1x3xf32, #tpu.memory_space<vmem>>, %arg17: memref<1x1x3xf32, #tpu.memory_space<vmem>>, %arg18: memref<8x32xf32, #tpu.memory_space<vmem>>) attributes {dimension_semantics = [#tpu.dimension_semantics<parallel>, #tpu.dimension_semantics<arbitrary>], iteration_bounds = array<i64: 2, 2>, scalar_prefetch = 0 : i64, scratch_operands = 1 : i64, tpu.core_type = #tpu.core_type<tc>, window_params = [{transform_indices = @transform_0, window_bounds = array<i64: 1, 8, 32>}, {transform_indices = @transform_1, window_bounds = array<i64: 1, 32, 96>}, {transform_indices = @transform_2, window_bounds = array<i64: 1, 1, 96>}, {transform_indices = @transform_3, window_bounds = array<i64: 1, 32, 32>}, {transform_indices = @transform_4, window_bounds = array<i64: 1, 1, 32>}, {transform_indices = @transform_5, window_bounds = array<i64: 1, 1, 32>}, {transform_indices = @transform_6, window_bounds = array<i64: 1, 1, 32>}, {transform_indices = @transform_7, window_bounds = array<i64: 1, 32, 64>}, {transform_indices = @transform_8, window_bounds = array<i64: 1, 1, 64>}, {transform_indices = @transform_9, window_bounds = array<i64: 1, 64, 32>}, {transform_indices = @transform_10, window_bounds = array<i64: 1, 1, 32>}, {transform_indices = @transform_11, window_bounds = array<i64: 1, 1, 32>}, {transform_indices = @transform_12, window_bounds = array<i64: 1, 1, 32>}, {pipeline_mode = #tpu.pipeline_mode<synchronous>, transform_indices = @transform_13, window_bounds = array<i64: 32, 3>}, {pipeline_mode = #tpu.pipeline_mode<synchronous>, transform_indices = @transform_14, window_bounds = array<i64: 1, 3>}, {transform_indices = @transform_15, window_bounds = array<i64: 1, 1, 3>}]} {
    %c0_i32 = arith.constant 0 : i32
    %0 = arith.cmpi eq, %arg1, %c0_i32 : i32
    %1 = arith.extui %0 : i1 to i32
    %c0_i32_0 = arith.constant 0 : i32
    %2 = arith.cmpi ne, %1, %c0_i32_0 : i32
    scf.if %2 {
      %c0_75 = arith.constant 0 : index
      %c0_76 = arith.constant 0 : index
      %c0_77 = arith.constant 0 : index
      %205 = vector.load %arg2[%c0_75, %c0_76, %c0_77] : memref<1x8x32xf32, #tpu.memory_space<vmem>>, vector<1x8x32xf32>
      %206 = vector.shape_cast %205 : vector<1x8x32xf32> to vector<8x32xf32>
      %c0_78 = arith.constant 0 : index
      %c0_79 = arith.constant 0 : index
      %207 = vector.load %arg18[%c0_78, %c0_79] : memref<8x32xf32, #tpu.memory_space<vmem>>, vector<8x32xf32>
      tpu.vector_store %arg18[%c0_78, %c0_79], %206 {strides = array<i32>} : memref<8x32xf32, #tpu.memory_space<vmem>>, vector<8x32xf32>,
    } else {
    }
    %c0 = arith.constant 0 : index
    %c0_1 = arith.constant 0 : index
    %3 = vector.load %arg18[%c0, %c0_1] : memref<8x32xf32, #tpu.memory_space<vmem>>, vector<8x32xf32>
    %c0_2 = arith.constant 0 : index
    %c0_3 = arith.constant 0 : index
    %c0_4 = arith.constant 0 : index
    %4 = vector.load %arg3[%c0_2, %c0_3, %c0_4] : memref<1x32x96xf32, #tpu.memory_space<vmem>>, vector<1x32x96xf32>
    %5 = vector.shape_cast %4 : vector<1x32x96xf32> to vector<32x96xf32>
    %c0_5 = arith.constant 0 : index
    %c0_6 = arith.constant 0 : index
    %c0_7 = arith.constant 0 : index
    %6 = vector.load %arg4[%c0_5, %c0_6, %c0_7] : memref<1x1x96xf32, #tpu.memory_space<vmem>>, vector<1x1x96xf32>
    %7 = vector.shape_cast %6 : vector<1x1x96xf32> to vector<1x96xf32>
    %c0_8 = arith.constant 0 : index
    %c0_9 = arith.constant 0 : index
    %c0_10 = arith.constant 0 : index
    %8 = vector.load %arg5[%c0_8, %c0_9, %c0_10] : memref<1x32x32xf32, #tpu.memory_space<vmem>>, vector<1x32x32xf32>
    %9 = vector.shape_cast %8 : vector<1x32x32xf32> to vector<32x32xf32>
    %c0_11 = arith.constant 0 : index
    %c0_12 = arith.constant 0 : index
    %c0_13 = arith.constant 0 : index
    %10 = vector.load %arg6[%c0_11, %c0_12, %c0_13] : memref<1x1x32xf32, #tpu.memory_space<vmem>>, vector<1x1x32xf32>
    %11 = vector.shape_cast %10 : vector<1x1x32xf32> to vector<1x32xf32>
    %c0_14 = arith.constant 0 : index
    %c0_15 = arith.constant 0 : index
    %c0_16 = arith.constant 0 : index
    %12 = vector.load %arg7[%c0_14, %c0_15, %c0_16] : memref<1x1x32xf32, #tpu.memory_space<vmem>>, vector<1x1x32xf32>
    %13 = vector.shape_cast %12 : vector<1x1x32xf32> to vector<1x32xf32>
    %c0_17 = arith.constant 0 : index
    %c0_18 = arith.constant 0 : index
    %c0_19 = arith.constant 0 : index
    %14 = vector.load %arg8[%c0_17, %c0_18, %c0_19] : memref<1x1x32xf32, #tpu.memory_space<vmem>>, vector<1x1x32xf32>
    %15 = vector.shape_cast %14 : vector<1x1x32xf32> to vector<1x32xf32>
    %c0_20 = arith.constant 0 : index
    %c0_21 = arith.constant 0 : index
    %c0_22 = arith.constant 0 : index
    %16 = vector.load %arg9[%c0_20, %c0_21, %c0_22] : memref<1x32x64xf32, #tpu.memory_space<vmem>>, vector<1x32x64xf32>
    %17 = vector.shape_cast %16 : vector<1x32x64xf32> to vector<32x64xf32>
    %c0_23 = arith.constant 0 : index
    %c0_24 = arith.constant 0 : index
    %c0_25 = arith.constant 0 : index
    %18 = vector.load %arg10[%c0_23, %c0_24, %c0_25] : memref<1x1x64xf32, #tpu.memory_space<vmem>>, vector<1x1x64xf32>
    %19 = vector.shape_cast %18 : vector<1x1x64xf32> to vector<1x64xf32>
    %c0_26 = arith.constant 0 : index
    %c0_27 = arith.constant 0 : index
    %c0_28 = arith.constant 0 : index
    %20 = vector.load %arg11[%c0_26, %c0_27, %c0_28] : memref<1x64x32xf32, #tpu.memory_space<vmem>>, vector<1x64x32xf32>
    %21 = vector.shape_cast %20 : vector<1x64x32xf32> to vector<64x32xf32>
    %c0_29 = arith.constant 0 : index
    %c0_30 = arith.constant 0 : index
    %c0_31 = arith.constant 0 : index
    %22 = vector.load %arg12[%c0_29, %c0_30, %c0_31] : memref<1x1x32xf32, #tpu.memory_space<vmem>>, vector<1x1x32xf32>
    %23 = vector.shape_cast %22 : vector<1x1x32xf32> to vector<1x32xf32>
    %c0_32 = arith.constant 0 : index
    %c0_33 = arith.constant 0 : index
    %c0_34 = arith.constant 0 : index
    %24 = vector.load %arg13[%c0_32, %c0_33, %c0_34] : memref<1x1x32xf32, #tpu.memory_space<vmem>>, vector<1x1x32xf32>
    %25 = vector.shape_cast %24 : vector<1x1x32xf32> to vector<1x32xf32>
    %c0_35 = arith.constant 0 : index
    %c0_36 = arith.constant 0 : index
    %c0_37 = arith.constant 0 : index
    %26 = vector.load %arg14[%c0_35, %c0_36, %c0_37] : memref<1x1x32xf32, #tpu.memory_space<vmem>>, vector<1x1x32xf32>
    %27 = vector.shape_cast %26 : vector<1x1x32xf32> to vector<1x32xf32>
    %28 = arith.truncf %3 : vector<8x32xf32> to vector<8x32xbf16>
    %29 = arith.truncf %5 : vector<32x96xf32> to vector<32x96xbf16>
    %cst = arith.constant dense<0.000000e+00> : vector<8x96xf32>
    %30 = tpu.matmul %28, %29, %cst {dimension_numbers = #tpu.dot_dimension_numbers<[1], [0], [0], [1], [0, 0, 1, 1], [], []>} : vector<8x32xbf16>, vector<32x96xbf16>, vector<8x96xf32> -> vector<8x96xf32>
    %31 = vector.broadcast %7 : vector<1x96xf32> to vector<8x96xf32>
    %32 = arith.addf %30, %31 : vector<8x96xf32>
    %33 = vector.extract_strided_slice %32 {offsets = [0, 0], sizes = [8, 8], strides = [1, 1]} : vector<8x96xf32> to vector<8x8xf32>
    %34 = vector.shape_cast %33 : vector<8x8xf32> to vector<1x8x8xf32>
    %35 = vector.extract_strided_slice %32 {offsets = [0, 32], sizes = [8, 8], strides = [1, 1]} : vector<8x96xf32> to vector<8x8xf32>
    %36 = vector.shape_cast %35 : vector<8x8xf32> to vector<1x8x8xf32>
    %37 = vector.extract_strided_slice %32 {offsets = [0, 64], sizes = [8, 8], strides = [1, 1]} : vector<8x96xf32> to vector<8x8xf32>
    %38 = vector.shape_cast %37 : vector<8x8xf32> to vector<1x8x8xf32>
    %39 = arith.truncf %34 : vector<1x8x8xf32> to vector<1x8x8xbf16>
    %40 = arith.truncf %36 : vector<1x8x8xf32> to vector<1x8x8xbf16>
    "tpu.trace_start"() <{level = 10 : i32, message = "bqd,bkd->bqk"}> : () -> ()
    %cst_38 = arith.constant dense<0.000000e+00> : vector<1x8x8xf32>
    %41 = tpu.matmul %39, %40, %cst_38 {dimension_numbers = #tpu.dot_dimension_numbers<[2], [2], [1], [1], [0, 0, 0, 1, 1, 1], [0], [0]>} : vector<1x8x8xbf16>, vector<1x8x8xbf16>, vector<1x8x8xf32> -> vector<1x8x8xf32>
    "tpu.trace_stop"() : () -> ()
    %cst_39 = arith.constant 0.353553385 : f32
    %42 = vector.broadcast %cst_39 : f32 to vector<1x8x8xf32>
    %43 = arith.mulf %41, %42 : vector<1x8x8xf32>
    %cst_40 = arith.constant dense<0xFF800000> : vector<1x8xf32>
    %44 = vector.multi_reduction <maximumf>, %43, %cst_40 [2] : vector<1x8x8xf32> to vector<1x8xf32>
    %45 = vector.shape_cast %44 : vector<1x8xf32> to vector<1x8x1xf32>
    %46 = vector.broadcast %45 : vector<1x8x1xf32> to vector<1x8x8xf32>
    %47 = arith.subf %43, %46 : vector<1x8x8xf32>
    %48 = math.exp %47 : vector<1x8x8xf32>
    %cst_41 = arith.constant dense<0.000000e+00> : vector<1x8xf32>
    %49 = vector.multi_reduction <add>, %48, %cst_41 [2] : vector<1x8x8xf32> to vector<1x8xf32>
    %50 = vector.shape_cast %49 : vector<1x8xf32> to vector<1x8x1xf32>
    %51 = tpu.reciprocal %50 {approx = true} : vector<1x8x1xf32> -> vector<1x8x1xf32>
    %52 = vector.broadcast %51 : vector<1x8x1xf32> to vector<1x8x8xf32>
    %53 = arith.mulf %48, %52 : vector<1x8x8xf32>
    %54 = arith.truncf %53 : vector<1x8x8xf32> to vector<1x8x8xbf16>
    %55 = arith.truncf %38 : vector<1x8x8xf32> to vector<1x8x8xbf16>
    "tpu.trace_start"() <{level = 10 : i32, message = "bqk,bkd->bqd"}> : () -> ()
    %cst_42 = arith.constant dense<0.000000e+00> : vector<1x8x8xf32>
    %56 = tpu.matmul %54, %55, %cst_42 {dimension_numbers = #tpu.dot_dimension_numbers<[2], [1], [1], [2], [0, 0, 0, 1, 1, 2], [0], [0]>} : vector<1x8x8xbf16>, vector<1x8x8xbf16>, vector<1x8x8xf32> -> vector<1x8x8xf32>
    "tpu.trace_stop"() : () -> ()
    %57 = vector.shape_cast %56 : vector<1x8x8xf32> to vector<8x8xf32>
    %58 = vector.extract_strided_slice %32 {offsets = [0, 8], sizes = [8, 8], strides = [1, 1]} : vector<8x96xf32> to vector<8x8xf32>
    %59 = vector.shape_cast %58 : vector<8x8xf32> to vector<1x8x8xf32>
    %60 = vector.extract_strided_slice %32 {offsets = [0, 40], sizes = [8, 8], strides = [1, 1]} : vector<8x96xf32> to vector<8x8xf32>
    %61 = vector.shape_cast %60 : vector<8x8xf32> to vector<1x8x8xf32>
    %62 = vector.extract_strided_slice %32 {offsets = [0, 72], sizes = [8, 8], strides = [1, 1]} : vector<8x96xf32> to vector<8x8xf32>
    %63 = vector.shape_cast %62 : vector<8x8xf32> to vector<1x8x8xf32>
    %64 = arith.truncf %59 : vector<1x8x8xf32> to vector<1x8x8xbf16>
    %65 = arith.truncf %61 : vector<1x8x8xf32> to vector<1x8x8xbf16>
    "tpu.trace_start"() <{level = 10 : i32, message = "bqd,bkd->bqk"}> : () -> ()
    %cst_43 = arith.constant dense<0.000000e+00> : vector<1x8x8xf32>
    %66 = tpu.matmul %64, %65, %cst_43 {dimension_numbers = #tpu.dot_dimension_numbers<[2], [2], [1], [1], [0, 0, 0, 1, 1, 1], [0], [0]>} : vector<1x8x8xbf16>, vector<1x8x8xbf16>, vector<1x8x8xf32> -> vector<1x8x8xf32>
    "tpu.trace_stop"() : () -> ()
    %cst_44 = arith.constant 0.353553385 : f32
    %67 = vector.broadcast %cst_44 : f32 to vector<1x8x8xf32>
    %68 = arith.mulf %66, %67 : vector<1x8x8xf32>
    %cst_45 = arith.constant dense<0xFF800000> : vector<1x8xf32>
    %69 = vector.multi_reduction <maximumf>, %68, %cst_45 [2] : vector<1x8x8xf32> to vector<1x8xf32>
    %70 = vector.shape_cast %69 : vector<1x8xf32> to vector<1x8x1xf32>
    %71 = vector.broadcast %70 : vector<1x8x1xf32> to vector<1x8x8xf32>
    %72 = arith.subf %68, %71 : vector<1x8x8xf32>
    %73 = math.exp %72 : vector<1x8x8xf32>
    %cst_46 = arith.constant dense<0.000000e+00> : vector<1x8xf32>
    %74 = vector.multi_reduction <add>, %73, %cst_46 [2] : vector<1x8x8xf32> to vector<1x8xf32>
    %75 = vector.shape_cast %74 : vector<1x8xf32> to vector<1x8x1xf32>
    %76 = tpu.reciprocal %75 {approx = true} : vector<1x8x1xf32> -> vector<1x8x1xf32>
    %77 = vector.broadcast %76 : vector<1x8x1xf32> to vector<1x8x8xf32>
    %78 = arith.mulf %73, %77 : vector<1x8x8xf32>
    %79 = arith.truncf %78 : vector<1x8x8xf32> to vector<1x8x8xbf16>
    %80 = arith.truncf %63 : vector<1x8x8xf32> to vector<1x8x8xbf16>
    "tpu.trace_start"() <{level = 10 : i32, message = "bqk,bkd->bqd"}> : () -> ()
    %cst_47 = arith.constant dense<0.000000e+00> : vector<1x8x8xf32>
    %81 = tpu.matmul %79, %80, %cst_47 {dimension_numbers = #tpu.dot_dimension_numbers<[2], [1], [1], [2], [0, 0, 0, 1, 1, 2], [0], [0]>} : vector<1x8x8xbf16>, vector<1x8x8xbf16>, vector<1x8x8xf32> -> vector<1x8x8xf32>
    "tpu.trace_stop"() : () -> ()
    %82 = vector.shape_cast %81 : vector<1x8x8xf32> to vector<8x8xf32>
    %83 = vector.extract_strided_slice %32 {offsets = [0, 16], sizes = [8, 8], strides = [1, 1]} : vector<8x96xf32> to vector<8x8xf32>
    %84 = vector.shape_cast %83 : vector<8x8xf32> to vector<1x8x8xf32>
    %85 = vector.extract_strided_slice %32 {offsets = [0, 48], sizes = [8, 8], strides = [1, 1]} : vector<8x96xf32> to vector<8x8xf32>
    %86 = vector.shape_cast %85 : vector<8x8xf32> to vector<1x8x8xf32>
    %87 = vector.extract_strided_slice %32 {offsets = [0, 80], sizes = [8, 8], strides = [1, 1]} : vector<8x96xf32> to vector<8x8xf32>
    %88 = vector.shape_cast %87 : vector<8x8xf32> to vector<1x8x8xf32>
    %89 = arith.truncf %84 : vector<1x8x8xf32> to vector<1x8x8xbf16>
    %90 = arith.truncf %86 : vector<1x8x8xf32> to vector<1x8x8xbf16>
    "tpu.trace_start"() <{level = 10 : i32, message = "bqd,bkd->bqk"}> : () -> ()
    %cst_48 = arith.constant dense<0.000000e+00> : vector<1x8x8xf32>
    %91 = tpu.matmul %89, %90, %cst_48 {dimension_numbers = #tpu.dot_dimension_numbers<[2], [2], [1], [1], [0, 0, 0, 1, 1, 1], [0], [0]>} : vector<1x8x8xbf16>, vector<1x8x8xbf16>, vector<1x8x8xf32> -> vector<1x8x8xf32>
    "tpu.trace_stop"() : () -> ()
    %cst_49 = arith.constant 0.353553385 : f32
    %92 = vector.broadcast %cst_49 : f32 to vector<1x8x8xf32>
    %93 = arith.mulf %91, %92 : vector<1x8x8xf32>
    %cst_50 = arith.constant dense<0xFF800000> : vector<1x8xf32>
    %94 = vector.multi_reduction <maximumf>, %93, %cst_50 [2] : vector<1x8x8xf32> to vector<1x8xf32>
    %95 = vector.shape_cast %94 : vector<1x8xf32> to vector<1x8x1xf32>
    %96 = vector.broadcast %95 : vector<1x8x1xf32> to vector<1x8x8xf32>
    %97 = arith.subf %93, %96 : vector<1x8x8xf32>
    %98 = math.exp %97 : vector<1x8x8xf32>
    %cst_51 = arith.constant dense<0.000000e+00> : vector<1x8xf32>
    %99 = vector.multi_reduction <add>, %98, %cst_51 [2] : vector<1x8x8xf32> to vector<1x8xf32>
    %100 = vector.shape_cast %99 : vector<1x8xf32> to vector<1x8x1xf32>
    %101 = tpu.reciprocal %100 {approx = true} : vector<1x8x1xf32> -> vector<1x8x1xf32>
    %102 = vector.broadcast %101 : vector<1x8x1xf32> to vector<1x8x8xf32>
    %103 = arith.mulf %98, %102 : vector<1x8x8xf32>
    %104 = arith.truncf %103 : vector<1x8x8xf32> to vector<1x8x8xbf16>
    %105 = arith.truncf %88 : vector<1x8x8xf32> to vector<1x8x8xbf16>
    "tpu.trace_start"() <{level = 10 : i32, message = "bqk,bkd->bqd"}> : () -> ()
    %cst_52 = arith.constant dense<0.000000e+00> : vector<1x8x8xf32>
    %106 = tpu.matmul %104, %105, %cst_52 {dimension_numbers = #tpu.dot_dimension_numbers<[2], [1], [1], [2], [0, 0, 0, 1, 1, 2], [0], [0]>} : vector<1x8x8xbf16>, vector<1x8x8xbf16>, vector<1x8x8xf32> -> vector<1x8x8xf32>
    "tpu.trace_stop"() : () -> ()
    %107 = vector.shape_cast %106 : vector<1x8x8xf32> to vector<8x8xf32>
    %108 = vector.extract_strided_slice %32 {offsets = [0, 24], sizes = [8, 8], strides = [1, 1]} : vector<8x96xf32> to vector<8x8xf32>
    %109 = vector.shape_cast %108 : vector<8x8xf32> to vector<1x8x8xf32>
    %110 = vector.extract_strided_slice %32 {offsets = [0, 56], sizes = [8, 8], strides = [1, 1]} : vector<8x96xf32> to vector<8x8xf32>
    %111 = vector.shape_cast %110 : vector<8x8xf32> to vector<1x8x8xf32>
    %112 = vector.extract_strided_slice %32 {offsets = [0, 88], sizes = [8, 8], strides = [1, 1]} : vector<8x96xf32> to vector<8x8xf32>
    %113 = vector.shape_cast %112 : vector<8x8xf32> to vector<1x8x8xf32>
    %114 = arith.truncf %109 : vector<1x8x8xf32> to vector<1x8x8xbf16>
    %115 = arith.truncf %111 : vector<1x8x8xf32> to vector<1x8x8xbf16>
    "tpu.trace_start"() <{level = 10 : i32, message = "bqd,bkd->bqk"}> : () -> ()
    %cst_53 = arith.constant dense<0.000000e+00> : vector<1x8x8xf32>
    %116 = tpu.matmul %114, %115, %cst_53 {dimension_numbers = #tpu.dot_dimension_numbers<[2], [2], [1], [1], [0, 0, 0, 1, 1, 1], [0], [0]>} : vector<1x8x8xbf16>, vector<1x8x8xbf16>, vector<1x8x8xf32> -> vector<1x8x8xf32>
    "tpu.trace_stop"() : () -> ()
    %cst_54 = arith.constant 0.353553385 : f32
    %117 = vector.broadcast %cst_54 : f32 to vector<1x8x8xf32>
    %118 = arith.mulf %116, %117 : vector<1x8x8xf32>
    %cst_55 = arith.constant dense<0xFF800000> : vector<1x8xf32>
    %119 = vector.multi_reduction <maximumf>, %118, %cst_55 [2] : vector<1x8x8xf32> to vector<1x8xf32>
    %120 = vector.shape_cast %119 : vector<1x8xf32> to vector<1x8x1xf32>
    %121 = vector.broadcast %120 : vector<1x8x1xf32> to vector<1x8x8xf32>
    %122 = arith.subf %118, %121 : vector<1x8x8xf32>
    %123 = math.exp %122 : vector<1x8x8xf32>
    %cst_56 = arith.constant dense<0.000000e+00> : vector<1x8xf32>
    %124 = vector.multi_reduction <add>, %123, %cst_56 [2] : vector<1x8x8xf32> to vector<1x8xf32>
    %125 = vector.shape_cast %124 : vector<1x8xf32> to vector<1x8x1xf32>
    %126 = tpu.reciprocal %125 {approx = true} : vector<1x8x1xf32> -> vector<1x8x1xf32>
    %127 = vector.broadcast %126 : vector<1x8x1xf32> to vector<1x8x8xf32>
    %128 = arith.mulf %123, %127 : vector<1x8x8xf32>
    %129 = arith.truncf %128 : vector<1x8x8xf32> to vector<1x8x8xbf16>
    %130 = arith.truncf %113 : vector<1x8x8xf32> to vector<1x8x8xbf16>
    "tpu.trace_start"() <{level = 10 : i32, message = "bqk,bkd->bqd"}> : () -> ()
    %cst_57 = arith.constant dense<0.000000e+00> : vector<1x8x8xf32>
    %131 = tpu.matmul %129, %130, %cst_57 {dimension_numbers = #tpu.dot_dimension_numbers<[2], [1], [1], [2], [0, 0, 0, 1, 1, 2], [0], [0]>} : vector<1x8x8xbf16>, vector<1x8x8xbf16>, vector<1x8x8xf32> -> vector<1x8x8xf32>
    "tpu.trace_stop"() : () -> ()
    %132 = vector.shape_cast %131 : vector<1x8x8xf32> to vector<8x8xf32>
    %133 = tpu.concatenate %57, %82, %107, %132 in 1 : vector<8x8xf32>, vector<8x8xf32>, vector<8x8xf32>, vector<8x8xf32> -> vector<8x32xf32>
    %134 = arith.truncf %133 : vector<8x32xf32> to vector<8x32xbf16>
    %135 = arith.truncf %9 : vector<32x32xf32> to vector<32x32xbf16>
    %cst_58 = arith.constant dense<0.000000e+00> : vector<8x32xf32>
    %136 = tpu.matmul %134, %135, %cst_58 {dimension_numbers = #tpu.dot_dimension_numbers<[1], [0], [0], [1], [0, 0, 1, 1], [], []>} : vector<8x32xbf16>, vector<32x32xbf16>, vector<8x32xf32> -> vector<8x32xf32>
    %137 = vector.broadcast %11 : vector<1x32xf32> to vector<8x32xf32>
    %138 = arith.addf %136, %137 : vector<8x32xf32>
    %139 = arith.addf %3, %138 : vector<8x32xf32>
    %cst_59 = arith.constant dense<0.000000e+00> : vector<8xf32>
    %140 = vector.multi_reduction <add>, %139, %cst_59 [1] : vector<8x32xf32> to vector<8xf32>
    %141 = vector.shape_cast %140 : vector<8xf32> to vector<8x1xf32>
    %cst_60 = arith.constant 3.200000e+01 : f32
    %142 = vector.broadcast %cst_60 : f32 to vector<8x1xf32>
    %143 = arith.divf %141, %142 : vector<8x1xf32>
    %144 = vector.broadcast %143 : vector<8x1xf32> to vector<8x32xf32>
    %145 = arith.subf %139, %144 : vector<8x32xf32>
    %146 = vector.broadcast %143 : vector<8x1xf32> to vector<8x32xf32>
    %147 = arith.subf %139, %146 : vector<8x32xf32>
    %148 = arith.mulf %145, %147 : vector<8x32xf32>
    %cst_61 = arith.constant dense<0.000000e+00> : vector<8xf32>
    %149 = vector.multi_reduction <add>, %148, %cst_61 [1] : vector<8x32xf32> to vector<8xf32>
    %150 = vector.shape_cast %149 : vector<8xf32> to vector<8x1xf32>
    %cst_62 = arith.constant 3.200000e+01 : f32
    %151 = vector.broadcast %cst_62 : f32 to vector<8x1xf32>
    %152 = arith.divf %150, %151 : vector<8x1xf32>
    %153 = vector.broadcast %143 : vector<8x1xf32> to vector<8x32xf32>
    %154 = arith.subf %139, %153 : vector<8x32xf32>
    %cst_63 = arith.constant 9.99999974E-6 : f32
    %155 = vector.broadcast %cst_63 : f32 to vector<8x1xf32>
    %156 = arith.addf %152, %155 : vector<8x1xf32>
    %157 = math.rsqrt %156 : vector<8x1xf32>
    %158 = vector.broadcast %157 : vector<8x1xf32> to vector<8x32xf32>
    %159 = arith.mulf %154, %158 : vector<8x32xf32>
    %160 = vector.broadcast %13 : vector<1x32xf32> to vector<8x32xf32>
    %161 = arith.mulf %159, %160 : vector<8x32xf32>
    %162 = vector.broadcast %15 : vector<1x32xf32> to vector<8x32xf32>
    %163 = arith.addf %161, %162 : vector<8x32xf32>
    %164 = arith.truncf %163 : vector<8x32xf32> to vector<8x32xbf16>
    %165 = arith.truncf %17 : vector<32x64xf32> to vector<32x64xbf16>
    %cst_64 = arith.constant dense<0.000000e+00> : vector<8x64xf32>
    %166 = tpu.matmul %164, %165, %cst_64 {dimension_numbers = #tpu.dot_dimension_numbers<[1], [0], [0], [1], [0, 0, 1, 1], [], []>} : vector<8x32xbf16>, vector<32x64xbf16>, vector<8x64xf32> -> vector<8x64xf32>
    %167 = vector.broadcast %19 : vector<1x64xf32> to vector<8x64xf32>
    %168 = arith.addf %166, %167 : vector<8x64xf32>
    %cst_65 = arith.constant 0.000000e+00 : f32
    %169 = vector.broadcast %cst_65 : f32 to vector<8x64xf32>
    %170 = arith.maximumf %168, %169 : vector<8x64xf32>
    %171 = arith.truncf %170 : vector<8x64xf32> to vector<8x64xbf16>
    %172 = arith.truncf %21 : vector<64x32xf32> to vector<64x32xbf16>
    %cst_66 = arith.constant dense<0.000000e+00> : vector<8x32xf32>
    %173 = tpu.matmul %171, %172, %cst_66 {dimension_numbers = #tpu.dot_dimension_numbers<[1], [0], [0], [1], [0, 0, 1, 1], [], []>} : vector<8x64xbf16>, vector<64x32xbf16>, vector<8x32xf32> -> vector<8x32xf32>
    %174 = vector.broadcast %23 : vector<1x32xf32> to vector<8x32xf32>
    %175 = arith.addf %173, %174 : vector<8x32xf32>
    %176 = arith.addf %163, %175 : vector<8x32xf32>
    %cst_67 = arith.constant dense<0.000000e+00> : vector<8xf32>
    %177 = vector.multi_reduction <add>, %176, %cst_67 [1] : vector<8x32xf32> to vector<8xf32>
    %178 = vector.shape_cast %177 : vector<8xf32> to vector<8x1xf32>
    %cst_68 = arith.constant 3.200000e+01 : f32
    %179 = vector.broadcast %cst_68 : f32 to vector<8x1xf32>
    %180 = arith.divf %178, %179 : vector<8x1xf32>
    %181 = vector.broadcast %180 : vector<8x1xf32> to vector<8x32xf32>
    %182 = arith.subf %176, %181 : vector<8x32xf32>
    %183 = vector.broadcast %180 : vector<8x1xf32> to vector<8x32xf32>
    %184 = arith.subf %176, %183 : vector<8x32xf32>
    %185 = arith.mulf %182, %184 : vector<8x32xf32>
    %cst_69 = arith.constant dense<0.000000e+00> : vector<8xf32>
    %186 = vector.multi_reduction <add>, %185, %cst_69 [1] : vector<8x32xf32> to vector<8xf32>
    %187 = vector.shape_cast %186 : vector<8xf32> to vector<8x1xf32>
    %cst_70 = arith.constant 3.200000e+01 : f32
    %188 = vector.broadcast %cst_70 : f32 to vector<8x1xf32>
    %189 = arith.divf %187, %188 : vector<8x1xf32>
    %190 = vector.broadcast %180 : vector<8x1xf32> to vector<8x32xf32>
    %191 = arith.subf %176, %190 : vector<8x32xf32>
    %cst_71 = arith.constant 9.99999974E-6 : f32
    %192 = vector.broadcast %cst_71 : f32 to vector<8x1xf32>
    %193 = arith.addf %189, %192 : vector<8x1xf32>
    %194 = math.rsqrt %193 : vector<8x1xf32>
    %195 = vector.broadcast %194 : vector<8x1xf32> to vector<8x32xf32>
    %196 = arith.mulf %191, %195 : vector<8x32xf32>
    %197 = vector.broadcast %25 : vector<1x32xf32> to vector<8x32xf32>
    %198 = arith.mulf %196, %197 : vector<8x32xf32>
    %199 = vector.broadcast %27 : vector<1x32xf32> to vector<8x32xf32>
    %200 = arith.addf %198, %199 : vector<8x32xf32>
    %c0_72 = arith.constant 0 : index
    %c0_73 = arith.constant 0 : index
    %201 = vector.load %arg18[%c0_72, %c0_73] : memref<8x32xf32, #tpu.memory_space<vmem>>, vector<8x32xf32>
    tpu.vector_store %arg18[%c0_72, %c0_73], %200 {strides = array<i32>} : memref<8x32xf32, #tpu.memory_space<vmem>>, vector<8x32xf32>,
    %c1_i32 = arith.constant 1 : i32
    %202 = arith.cmpi eq, %arg1, %c1_i32 : i32
    %203 = arith.extui %202 : i1 to i32
    %c0_i32_74 = arith.constant 0 : i32
    %204 = arith.cmpi ne, %203, %c0_i32_74 : i32
    scf.if %204 {
      %205 = vector.shape_cast %200 : vector<8x32xf32> to vector<1x8x32xf32>
      %cst_75 = arith.constant dense<0.000000e+00> : vector<1x32xf32>
      %206 = vector.multi_reduction <add>, %205, %cst_75 [1] : vector<1x8x32xf32> to vector<1x32xf32>
      %cst_76 = arith.constant 1.250000e-01 : f32
      %207 = vector.broadcast %cst_76 : f32 to vector<1x32xf32>
      %208 = arith.mulf %206, %207 : vector<1x32xf32>
      %c0_77 = arith.constant 0 : index
      %c0_78 = arith.constant 0 : index
      %209 = vector.load %arg15[%c0_77, %c0_78] : memref<32x3xf32, #tpu.memory_space<vmem>>, vector<32x3xf32>
      %210 = arith.truncf %208 : vector<1x32xf32> to vector<1x32xbf16>
      %211 = arith.truncf %209 : vector<32x3xf32> to vector<32x3xbf16>
      %cst_79 = arith.constant dense<0.000000e+00> : vector<1x3xf32>
      %212 = tpu.matmul %210, %211, %cst_79 {dimension_numbers = #tpu.dot_dimension_numbers<[1], [0], [0], [1], [0, 0, 1, 1], [], []>} : vector<1x32xbf16>, vector<32x3xbf16>, vector<1x3xf32> -> vector<1x3xf32>
      %c0_80 = arith.constant 0 : index
      %c0_81 = arith.constant 0 : index
      %213 = vector.load %arg16[%c0_80, %c0_81] : memref<1x3xf32, #tpu.memory_space<vmem>>, vector<1x3xf32>
      %214 = arith.addf %212, %213 : vector<1x3xf32>
      %215 = vector.shape_cast %214 : vector<1x3xf32> to vector<1x1x3xf32>
      %c0_82 = arith.constant 0 : index
      %c0_83 = arith.constant 0 : index
      %c0_84 = arith.constant 0 : index
      %216 = vector.load %arg17[%c0_82, %c0_83, %c0_84] : memref<1x1x3xf32, #tpu.memory_space<vmem>>, vector<1x1x3xf32>
      tpu.vector_store %arg17[%c0_82, %c0_83, %c0_84], %215 {strides = array<i32>} : memref<1x1x3xf32, #tpu.memory_space<vmem>>, vector<1x1x3xf32>,
    } else {
    }
    return
  }
  func.func @transform_0(%arg0: i32, %arg1: i32) -> (i32, i32, i32) {
    %c0_i32 = arith.constant 0 : i32
    %c0_i32_0 = arith.constant 0 : i32
    %c0_i32_1 = arith.constant 0 : i32
    return %arg0, %c0_i32, %c0_i32_0 : i32, i32, i32
  }
  func.func @transform_1(%arg0: i32, %arg1: i32) -> (i32, i32, i32) {
    %c0_i32 = arith.constant 0 : i32
    %c0_i32_0 = arith.constant 0 : i32
    %c0_i32_1 = arith.constant 0 : i32
    return %arg1, %c0_i32, %c0_i32_0 : i32, i32, i32
  }
  func.func @transform_2(%arg0: i32, %arg1: i32) -> (i32, i32, i32) {
    %c0_i32 = arith.constant 0 : i32
    %c0_i32_0 = arith.constant 0 : i32
    %c0_i32_1 = arith.constant 0 : i32
    return %arg1, %c0_i32, %c0_i32_0 : i32, i32, i32
  }
  func.func @transform_3(%arg0: i32, %arg1: i32) -> (i32, i32, i32) {
    %c0_i32 = arith.constant 0 : i32
    %c0_i32_0 = arith.constant 0 : i32
    %c0_i32_1 = arith.constant 0 : i32
    return %arg1, %c0_i32, %c0_i32_0 : i32, i32, i32
  }
  func.func @transform_4(%arg0: i32, %arg1: i32) -> (i32, i32, i32) {
    %c0_i32 = arith.constant 0 : i32
    %c0_i32_0 = arith.constant 0 : i32
    %c0_i32_1 = arith.constant 0 : i32
    return %arg1, %c0_i32, %c0_i32_0 : i32, i32, i32
  }
  func.func @transform_5(%arg0: i32, %arg1: i32) -> (i32, i32, i32) {
    %c0_i32 = arith.constant 0 : i32
    %c0_i32_0 = arith.constant 0 : i32
    %c0_i32_1 = arith.constant 0 : i32
    return %arg1, %c0_i32, %c0_i32_0 : i32, i32, i32
  }
  func.func @transform_6(%arg0: i32, %arg1: i32) -> (i32, i32, i32) {
    %c0_i32 = arith.constant 0 : i32
    %c0_i32_0 = arith.constant 0 : i32
    %c0_i32_1 = arith.constant 0 : i32
    return %arg1, %c0_i32, %c0_i32_0 : i32, i32, i32
  }
  func.func @transform_7(%arg0: i32, %arg1: i32) -> (i32, i32, i32) {
    %c0_i32 = arith.constant 0 : i32
    %c0_i32_0 = arith.constant 0 : i32
    %c0_i32_1 = arith.constant 0 : i32
    return %arg1, %c0_i32, %c0_i32_0 : i32, i32, i32
  }
  func.func @transform_8(%arg0: i32, %arg1: i32) -> (i32, i32, i32) {
    %c0_i32 = arith.constant 0 : i32
    %c0_i32_0 = arith.constant 0 : i32
    %c0_i32_1 = arith.constant 0 : i32
    return %arg1, %c0_i32, %c0_i32_0 : i32, i32, i32
  }
  func.func @transform_9(%arg0: i32, %arg1: i32) -> (i32, i32, i32) {
    %c0_i32 = arith.constant 0 : i32
    %c0_i32_0 = arith.constant 0 : i32
    %c0_i32_1 = arith.constant 0 : i32
    return %arg1, %c0_i32, %c0_i32_0 : i32, i32, i32
  }
  func.func @transform_10(%arg0: i32, %arg1: i32) -> (i32, i32, i32) {
    %c0_i32 = arith.constant 0 : i32
    %c0_i32_0 = arith.constant 0 : i32
    %c0_i32_1 = arith.constant 0 : i32
    return %arg1, %c0_i32, %c0_i32_0 : i32, i32, i32
  }
  func.func @transform_11(%arg0: i32, %arg1: i32) -> (i32, i32, i32) {
    %c0_i32 = arith.constant 0 : i32
    %c0_i32_0 = arith.constant 0 : i32
    %c0_i32_1 = arith.constant 0 : i32
    return %arg1, %c0_i32, %c0_i32_0 : i32, i32, i32
  }
  func.func @transform_12(%arg0: i32, %arg1: i32) -> (i32, i32, i32) {
    %c0_i32 = arith.constant 0 : i32
    %c0_i32_0 = arith.constant 0 : i32
    %c0_i32_1 = arith.constant 0 : i32
    return %arg1, %c0_i32, %c0_i32_0 : i32, i32, i32
  }
  func.func @transform_13(%arg0: i32, %arg1: i32) -> (i32, i32) {
    %c0_i32 = arith.constant 0 : i32
    %c0_i32_0 = arith.constant 0 : i32
    %c0_i32_1 = arith.constant 0 : i32
    return %c0_i32, %c0_i32_0 : i32, i32
  }
  func.func @transform_14(%arg0: i32, %arg1: i32) -> (i32, i32) {
    %c0_i32 = arith.constant 0 : i32
    %c0_i32_0 = arith.constant 0 : i32
    %c0_i32_1 = arith.constant 0 : i32
    return %c0_i32, %c0_i32_0 : i32, i32
  }
  func.func @transform_15(%arg0: i32, %arg1: i32) -> (i32, i32, i32) {
    %c0_i32 = arith.constant 0 : i32
    %c0_i32_0 = arith.constant 0 : i32
    %c0_i32_1 = arith.constant 0 : i32
    return %arg0, %c0_i32, %c0_i32_0 : i32, i32, i32
  }
}

</mosaic_0001>

<bundles_post_ra>
// kernel: transformer_model_forward.2
= control target key start
LH: loop header
LB: loop body
LE: loop exit
PB: predicated region body
PF: predicated region fallthrough
CT: control target
= control target key end

     0   :  { %s231_s0 = inlined_call_operand.vmem [shape: s32[16], index: 0, kind: input, shape index: {}]   ;;  %s232_s1 = inlined_call_operand.vmem [shape: f32[100,1,32], index: 1, kind: input, shape index: {}]   ;;  %s233_s2 = inlined_call_operand.vmem [shape: f32[16,1,32], index: 2, kind: output, shape index: {}]  }
   0x1   :  { %s7_s11 = sshll.u32 %s231_s0, 4  ;;  %s8_s11 = int_to_ptr.vmem [resolvable:$true] %s7_s11 }
   0x2   :  { %s184_s12 = scalar_lea.vmem %s8_s11, 16  ;;  %p189_p1 = scmp.lt.s32.totalorder %s8_s11, %s8_s11 }
   0x3   :  { %p185_p0 = scmp.ne.s32.totalorder %s8_s11, %s184_s12  ;;  %p190_p2 = scmp.lt.s32.totalorder %s184_s12, %s184_s12 }
   0x5   :  { %p191_p3 = por %p190_p2, %p189_p1 }
   0x7   :  { %p192_p4 = pnand %p191_p3, %p185_p0 }
   0x9   :  { %195 = shalt.err (!%p192_p4)  }
   0xa   :  { %s206_s13 = smov [#allocation3]  }
   0xb   :  { %10 = dma.vmem_to_smem %s8_s11, 16, %s206_s13, [#allocation2] }
   0xc   :  { %200 = dma.done.wait [#allocation2], 16 }
   0xd   :  { %201 = vsyncadd [#allocation2], 4294967280 }
   0xe   :  { %12 = sfence }
   0xf   :  { %s202_s14 = smov 0  }
  0x10 LB: > { %s168_s15 = sadd.s32 4294967295, %s204_s14   ;;  %p172_p5 = scmp.ge.s32.totalorder %s204_s14, 1  ;;  %s204_s14 = sphi %s202_s14, %s18_s14  }
  0x11   : > { %p96_p6 = scmp.lt.s32.totalorder %s204_s14, 17 }
  0x13   : > { %p97_p7 = pnand %p172_p5, %p96_p6 }
  0x14   : > { %s113_s0 = sld [smem:[#allocation3 + %s168_s15]] (!%p97_p7)  ;;  %p118_p8 = scmp.lt.s32.totalorder (!%p97_p7), %s168_s15, 15  ;;  %vm122_vm0 = vcmask (!%p97_p7), 253952  }
  0x15   : > { %100 = sbr.rel (%p97_p7) target bundleno = 32 (0x20), region = 24 }
  0x1a   : > { %p114_p9 = scmp.lt.s32.totalorder (!%p97_p7), %s113_s0, 99 }
  0x1c   : > { %s235_s15 = smov (!%p118_p8, %s168_s15), 15  ;;  %s237_s0 = smov (!%p114_p9, %s113_s0), 99 }
  0x1d   : > { %s120_s18 = scalar_lea.vmem %s233_s2, %s235_s15  ;;  %s116_s21 = scalar_lea.vmem %s232_s1, %s237_s0 }
  0x1e   : > { %v121_v0 = vld [vmem:[%s116_s21] sm:$0x1] }
  0x1f   : > { %123 = vst.msk [vmem:[%s120_s18] sm:$0x1] %vm122_vm0, %v121_v0 }
  0x20 PF: > { %s18_s14 = sadd.s32 1, %s204_s14  }
  0x21   : > { %p15_p10 = scmp.ge.s32.totalorder %s18_s14, 18  }
  0x23   :  { %17 = sbr.rel (!%p15_p10) target bundleno = 16 (0x10), region = 54 }

// kernel: transformer_model_forward.3
= control target key start
LH: loop header
LB: loop body
LE: loop exit
PB: predicated region body
PF: predicated region fallthrough
CT: control target
= control target key end

     0   :  { %s2560_s0 = inlined_call_operand.vmem [shape: f32[2,8,32], index: 0, kind: input, shape index: {}]   ;;  %s2561_s1 = inlined_call_operand.vmem [shape: f32[2,32,96], index: 1, kind: input, shape index: {}]   ;;  %s2562_s2 = inlined_call_operand.vmem [shape: f32[2,1,96], index: 2, kind: input, shape index: {}]   ;;  %s2563_s3 = inlined_call_operand.vmem [shape: f32[2,32,32], index: 3, kind: input, shape index: {}]   ;;  %s2564_s4 = inlined_call_operand.vmem [shape: f32[2,1,32], index: 4, kind: input, shape index: {}]   ;;  %s2565_s5 = inlined_call_operand.vmem [shape: f32[2,1,32], index: 5, kind: input, shape index: {}]   ;;  %s2566_s6 = inlined_call_operand.vmem [shape: f32[2,1,32], index: 6, kind: input, shape index: {}]   ;;  %s2567_s7 = inlined_call_operand.vmem [shape: f32[2,32,64], index: 7, kind: input, shape index: {}]   ;;  %s2568_s8 = inlined_call_operand.vmem [shape: f32[2,1,64], index: 8, kind: input, shape index: {}]   ;;  %s2569_s9 = inlined_call_operand.vmem [shape: f32[2,64,32], index: 9, kind: input, shape index: {}]   ;;  %s2570_s10 = inlined_call_operand.vmem [shape: f32[2,1,32], index: 10, kind: input, shape index: {}]   ;;  %s2571_s11 = inlined_call_operand.vmem [shape: f32[2,1,32], index: 11, kind: input, shape index: {}]   ;;  %s2572_s12 = inlined_call_operand.vmem [shape: f32[2,1,32], index: 12, kind: input, shape index: {}]   ;;  %s2573_s13 = inlined_call_operand.vmem [shape: f32[32,3], index: 13, kind: input, shape index: {}]   ;;  %s2574_s14 = inlined_call_operand.vmem [shape: f32[1,3], index: 14, kind: input, shape index: {}]   ;;  %s2575_s15 = inlined_call_operand.hbm [shape: f32[2,1,3], index: 15, kind: output, shape index: {}]  }
   0x1   :  { %2590 = sst [smem:[#allocation18_spill]] %s2560_s0 }
   0x2   :  { %2591 = sst [smem:[#allocation19_spill]] %s2561_s1 }
   0x3   :  { %2592 = sst [smem:[#allocation20_spill]] %s2563_s3 }
   0x4   :  { %2593 = sst [smem:[#allocation21_spill]] %s2567_s7 }
   0x5   :  { %2594 = sst [smem:[#allocation22_spill]] %s2572_s12 }
   0x6   :  { %2595 = sst [smem:[#allocation23_spill]] %s2573_s13 }
   0x7   :  { %2596 = sst [smem:[#allocation24_spill]] %s2574_s14 }
   0x8   :  { %2597 = sst [smem:[#allocation25_spill]] %s2575_s15 }
   0x9   :  { %20 = vsyncpa [#allocation4], 0 }
   0xa   :  { %22 = vsyncpa [#allocation4 + $0x1], 0  ;;  %s2201_s18 = smov 0   ;;  %s2203_s19 = smov 0  }
   0xb   :  { %s2205_s20 = smov 0   ;;  %s2207_s21 = smov 0  }
   0xc   :  { %s2209_s22 = smov 0   ;;  %s2211_s23 = smov 0  }
   0xd   :  { %s2213_s24 = smov 0   ;;  %s2215_s25 = smov 0  }
   0xe LB: > { %2598 = sst [smem:[#allocation6_spill]] %s2072_s18  ;;  %s1728_s26 = sadd.s32 4294967295, %s2100_s25   ;;  %s2100_s25 = sphi %s2215_s25, %s28_s25   ;;  %s2096_s24 = sphi %s2213_s24, %s2641_s24   ;;  %s2092_s23 = sphi %s2211_s23, %s2640_s23   ;;  %s2088_s22 = sphi %s2209_s22, %s2639_s22   ;;  %s2084_s21 = sphi %s2207_s21, %s2638_s21   ;;  %s2080_s20 = sphi %s2205_s20, %s2637_s20   ;;  %s2076_s19 = sphi %s2203_s19, %s2643_s19   ;;  %s2072_s18 = sphi %s2201_s18, %s2642_s18  }
   0xf   : > { %2599 = sst [smem:[#allocation7_spill]] %s2080_s20  ;;  %s1729_s27 = sadd.s32 4294967294, %s2100_s25  }
  0x10   : > { %2600 = sst [smem:[#allocation8_spill]] %s2084_s21  ;;  %s37_s28 = sadd.s32 1, %s2092_s23 }
  0x11   : > { %2601 = sst [smem:[#allocation9_spill]] %s2088_s22  ;;  %p38_p0 = scmp.ge.s32.totalorder %s37_s28, 2 }
  0x12   : > { %2602 = sst [smem:[#allocation10_spill]] %s2092_s23  ;;  %s40_s29 = sadd.s32 1, %s2096_s24 }
  0x13   : > { %2603 = sst [smem:[#allocation11_spill]] %s2096_s24  ;;  %p437_p1 = scmp.ne.s32.totalorder %s2080_s20, %s2076_s19 }
  0x14   : > { %2604 = sst [smem:[#allocation12_spill]] %s2100_s25  ;;  %p438_p2 = scmp.eq.s32.totalorder %s1728_s26, 3 }
  0x15   : > { %s2645_s28 = smov (%p38_p0, %s37_s28), 0  ;;  %s2647_s29 = smov (!%p38_p0, %s40_s29), %s2096_s24 }
  0x16   : > { %2605 = sst [smem:[#allocation13_spill]] %s2645_s28  ;;  %p2250_p3 = por %p438_p2, %p437_p1 }
  0x17   : > { %p443_p4 = scmp.ne.s32.totalorder %s2076_s19, %s2072_s18  ;;  %p42_p5 = scmp.ge.s32.totalorder %s2647_s29, 2 }
  0x18   : > { %s2606_s30 = scalar_select %p2250_p3, 1, 0 }
  0x19   : > { %p444_p6 = scmp.eq.s32.totalorder %s1729_s27, 3  ;;  %p1732_p7 = scmp.ge.s32.totalorder %s2100_s25, 1 }
  0x1a   : > { %2607 = sst [smem:[#allocation14_spill]] %s2606_s30  ;;  %p555_p8 = scmp.lt.s32.totalorder %s2100_s25, 5 }
  0x1b   : > { %s2649_s29 = smov (%p42_p5, %s2647_s29), 0  ;;  %p2260_p9 = por %p444_p6, %p443_p4 }
  0x1c   : > { %2608 = sst [smem:[#allocation15_spill]] %s2649_s29  ;;  %p556_p10 = pnand %p1732_p7, %p555_p8 }
  0x1d   : > { %s2609_s16 = scalar_select %p2260_p9, 1, 0 }
  0x1e   : > { %s424_s17 = ssub.s32 %s2096_s24, %s2649_s29  ;;  %s427_s26 = sadd.s32 1, %s2080_s20 }
  0x1f   : > { %2610 = sst [smem:[#allocation16_spill]] %s2609_s16  ;;  %p425_p11 = scmp.eq.s32.totalorder %s424_s17, 0 }
  0x20   : > { %559 = sbr.rel (%p556_p10) target bundleno = 2864 (0xb30), region = 80  ;;  %p645_p12 = scmp.lt.s32.totalorder (!%p556_p10), %s2088_s22, 1 }
  0x21   : > { %s2268_s28 = scalar_select %p425_p11, %s2080_s20, %s427_s26  }
  0x22   : > { %p649_p13 = scmp.lt.s32.totalorder (!%p556_p10), %s2084_s21, 1  ;;  %s2612_s0 = sld [smem:[#allocation18_spill]] (!%p556_p10) }
  0x23   : > { %2611 = sst [smem:[#allocation17_spill]] %s2268_s28  ;;  %s2613_s1 = sld [smem:[#allocation19_spill]] (!%p556_p10) }
  0x24   : > { %s2614_s3 = sld [smem:[#allocation20_spill]] (!%p556_p10)  ;;  %s2615_s7 = sld [smem:[#allocation21_spill]] (!%p556_p10) }
  0x25   : > { %s2616_s28 = sld [smem:[#allocation22_spill]] (!%p556_p10)  ;;  %s2617_s14 = sand.u32 (!%p556_p10), 1, %s2076_s19  }
  0x26   : > { %s2618_s30 = sld [smem:[#allocation8_spill]] (!%p556_p10) }
  0x27   : > { %s646_s23 = scalar_select %p645_p12, %s2088_s22, 1 }
  0x28   : > { %s2275_s18 = scalar_select %p649_p13, %s2084_s21, 1 }
  0x29   : > { %s1733_s17 = sshll.u32 %s646_s23, 3  ;;  %s2334_s22 = scalar_lea.vmem [#allocation3], %s2617_s14 }
  0x2a   : > { %s648_s27 = scalar_lea.vmem %s2612_s0, %s1733_s17  ;;  %s1768_s24 = sshll.u32 %s2275_s18, 5 }
  0x2b   : > { %s653_s16 = scalar_lea.vmem %s2613_s1, %s1768_s24  ;;  %s2291_s13 = scalar_lea.vmem %s2614_s3, %s1768_s24 }
  0x2c   : > { %s2308_s25 = scalar_lea.vmem %s2615_s7, %s1768_s24  ;;  %s1771_s3 = sshll.u32 %s2275_s18, 6 }
  0x2d   : > { %s686_s29 = scalar_lea.vmem %s2570_s10, %s2275_s18  ;;  %s2322_s0 = scalar_lea.vmem %s2569_s9, %s1771_s3 }
  0x2e   : > { %s689_s1 = scalar_lea.vmem %s2571_s11, %s2275_s18  ;;  %s692_s7 = scalar_lea.vmem %s2616_s28, %s2275_s18 }
  0x2f   : > { %p1742_p0 = scmp.ne.s32.totalorder %s2618_s30, 0 }
  0x30   : > { %v698_v0 = vld [vmem:[%s648_s27] sm:$0xff] (!%p1742_p0)  ;;  %vm699_vm0 = vcmask (!%p1742_p0), 261120  }
  0x31   : > { %697 = sbr.rel (%p1742_p0) target bundleno = 56 (0x38), region = 84  ;;  %700 = vst.msk [vmem:[#allocation2] sm:$0xff] (!%p1742_p0), %vm699_vm0, %v698_v0 }
  0x38 PF: > { %v702_v1 = vld [vmem:[%s653_s16] sm:$0xff]  ;;  %v703_v2 = vld [vmem:[%s653_s16 + $0x8] sm:$0xff]  ;;  %v704_v3 = vld [vmem:[%s653_s16 + $0x10] sm:$0xff]  ;;  %v2102_v4 = vmov 0.0   ;;  %vm2103_vm1 = vmmov 0   ;;  %vm739_vm2 = vcmask 261120  }
  0x39   : > { %1805 = vmatprep.subr.bf16.mxu0 %v2102_v4  ;;  %v731_v5 = vpack.c.bf16 %v703_v2, %v702_v1  ;;  %v705_v6 = vld [vmem:[%s653_s16 + $0x18] sm:$0xff]  ;;  %1809 = vmatprep.mubr.msk.bf16.mxu0 %vm2103_vm1, %v2102_v4  ;;  %v2343_v8 = vld [vmem:[#allocation2] sm:$0xff]  ;;  %s2619_s16 = scalar_lea.vmem %s2562_s2, %s2275_s18  ;;  %s2104_s27 = smov 120   ;;  %vm787_vm3 = vcmask 64512   ;;  %vm852_vm4 = vcmask 1043456   ;;  %vm1242_vm5 = vcmask 130048  }
  0x3a   : > { %1813 = vmatprep.subr.bf16.mxu1 %v2102_v4  ;;  %1815 = vmatprep.mubr.msk.bf16.mxu1 %vm2103_vm1, %v2102_v4  ;;  %v732_v7 = vpack.c.bf16 %v705_v6, %v704_v3  ;;  %v730_v9 = vpack.c.bf16 %v2343_v8, %v2343_v8  ;;  %v1743_v10 = vld [vmem:[%s2619_s16] ss:$0 sm:$0xff]  ;;  %s2105_s28 = smov 96   ;;  %s2106_s21 = smov 80   ;;  %vm1244_vm6 = vcmask 195584   ;;  %vm1391_vm7 = vcmask 523264  }
  0x3b   : > { %1806 = vmatpush3.bf16.msra.mxu0 %v731_v5  ;;  %s2107_s23 = smov 88   ;;  %s2108_s26 = smov 72  }
  0x3c   : > { %1807 = vmatprep.subr.bf16.mxu0 %v2102_v4  ;;  %s2109_s17 = smov 112   ;;  %s2110_s12 = smov 104  }
  0x3d   : > { %s2111_s20 = smov 56   ;;  %s2112_s24 = smov 64  }
  0x3e   : > { %s2113_s15 = smov 40   ;;  %s2114_s14 = smov 48  }
  0x3f   : > { %1808 = vmatpush3.bf16.msra.mxu0 %v732_v7  ;;  %s2115_s3 = smov 8   ;;  %s2116_s30 = smov 16  }
  0x40   : > { %1819 = vmatprep.subr.bf16.mxu0 %v2102_v4  ;;  %s2117_s16 = smov 24  }
  0x42   : > { %1810 = vmatmul.mubr.msk.bf16.vlgmr.msra.gmra.mrb[0].mxu0 %vm739_vm2, %v730_v9 }
  0x43   : > { %1821 = vmatprep.mubr.msk.bf16.mxu0 %vm2103_vm1, %v2102_v4 }
 0x115   : > { %v777_v11 = vpop.f32.mrb[0].mxu0 }
 0x116   : > { %v778_v12 = vadd.f32 %v1743_v10, %v777_v11  ;;  %v1811_v13 = vpop.f32.mrb[1].mxu0 }
 0x117   : > { %v780_v14 = vpop.f32.mrb[2].mxu0 }
 0x118   : > { %v2357_v15 = vpack.c.bf16 %v778_v12, %v778_v12  ;;  %v1812_v16 = vpop.f32.mrb[3].mxu0 }
 0x11a   : > { %896 = vrot.lane.b32.xlu1 %v2357_v15, %s2104_s27  ;;  %785 = vrot.lane.b32.xlu0 %v2357_v15, %s2105_s28  ;;  %s2620_s28 = scalar_lea.vmem %s2564_s4, %s2275_s18  ;;  %s2625_s27 = sld [smem:[#allocation8_spill]] }
 0x11e   : > { %1009 = vrot.lane.b32.xlu1 %v2357_v15, %s2106_s21  ;;  %898 = vrot.lane.b32.xlu0 %v2357_v15, %s2107_s23  ;;  %s2621_s23 = scalar_lea.vmem %s2565_s5, %s2275_s18 }
 0x120   : > { %p1763_p1 = scmp.ne.s32.totalorder %s2625_s27, 1 }
 0x121   : > { %s2626_s21 = sld [smem:[#allocation23_spill]] (!%p1763_p1)  ;;  %vm2119_vm8 = vmmov (!%p1763_p1), 0   ;;  %vm1527_vm9 = vcmask (!%p1763_p1), 16384  }
 0x122   : > { %1120 = vrot.lane.b32.xlu1 %v2357_v15, %s2108_s26  ;;  %1007 = vrot.lane.b32.xlu0 %v2357_v15, %s2109_s17 }
 0x126   : > { %1118 = vrot.lane.b32.xlu0 %v2357_v15, %s2110_s12  ;;  %s2622_s12 = scalar_lea.vmem %s2566_s6, %s2275_s18 }
 0x127   : > { %s2627_s26 = smov (!%p1763_p1), %s2626_s21 }
 0x18c   : > { %v786_v17 = vpop.permute.xlu0 %785  ;;  %v897_v20 = vpop.permute.xlu1 %896 }
 0x18d   : > { %v792_v18 = vsel %vm787_vm3, %v786_v17, 0 }
 0x18e   : > { %1814 = vmatpush3.bf16.xpose.msra.mxu1 %v792_v18 }
 0x18f   : > { %1825 = vmatprep.subr.bf16.mxu1 %v2102_v4 }
 0x190   : > { %v899_v19 = vpop.permute.xlu0 %898  ;;  %v1010_v22 = vpop.permute.xlu1 %1009 }
 0x191   : > { %v904_v21 = vsel %vm787_vm3, %v899_v19, 0  ;;  %v1015_v23 = vsel %vm787_vm3, %v1010_v22, 0 }
 0x194   : > { %v1121_v24 = vpop.permute.xlu1 %1120  ;;  %v1008_v25 = vpop.permute.xlu0 %1007 }
 0x195   : > { %1816 = vmatmul.mubr.msk.bf16.vlgmr.msra.gmra.mrb[0].mxu1 %vm787_vm3, %v2357_v15  ;;  %v1126_v26 = vsel %vm787_vm3, %v1121_v24, 0 }
 0x196   : > { %1826 = vmatpush3.bf16.xpose.msra.mxu1 %v904_v21  ;;  %1827 = vmatprep.mubr.msk.bf16.mxu1 %vm2103_vm1, %v2102_v4 }
 0x197   : > { %1837 = vmatprep.subr.bf16.mxu1 %v2102_v4 }
 0x198   : > { %v1119_v27 = vpop.permute.xlu0 %1118 }
 0x19d   : > { %1828 = vmatmul.mubr.msk.bf16.vlgmr.msra.gmra.mrb[4].mxu1 %vm787_vm3, %v897_v20 }
 0x19e   : > { %1838 = vmatpush3.bf16.xpose.msra.mxu1 %v1015_v23  ;;  %1839 = vmatprep.mubr.msk.bf16.mxu1 %vm2103_vm1, %v2102_v4 }
 0x19f   : > { %1849 = vmatprep.subr.bf16.mxu1 %v2102_v4 }
 0x1a5   : > { %1840 = vmatmul.mubr.msk.bf16.vlgmr.msra.gmra.mrb[8].mxu1 %vm787_vm3, %v1008_v25 }
 0x1a6   : > { %1850 = vmatpush3.bf16.xpose.msra.mxu1 %v1126_v26  ;;  %1851 = vmatprep.mubr.msk.bf16.mxu1 %vm2103_vm1, %v2102_v4 }
 0x1a7   : > { %1861 = vmatprep.subr.bf16.mxu1 %v2102_v4 }
 0x1ad   : > { %1852 = vmatmul.mubr.msk.bf16.vlgmr.msra.gmra.mrb[12].mxu1 %vm787_vm3, %v1119_v27 }
 0x1ae   : > { %1865 = vmatprep.mubr.msk.bf16.mxu1 %vm2103_vm1, %v2102_v4 }
 0x268   : > { %v828_v28 = vpop.f32.mrb[0].mxu1 }
 0x269   : > { %v834_v29 = vmul.f32 0.35355338, %v828_v28  ;;  %v1817_v30 = vpop.f32.mrb[1].mxu1 }
 0x26a   : > { %v831_v31 = vpop.f32.mrb[2].mxu1 }
 0x26b   : > { %v1818_v32 = vpop.f32.mrb[3].mxu1  ;;  %v835_v33 = vsel %vm787_vm3, %v834_v29, -inf }
 0x26c   : > { %836 = vmax.xlane.f32.xlu1 %v835_v33 }
 0x270   : > { %v940_v34 = vpop.f32.mrb[4].mxu1 }
 0x271   : > { %v946_v35 = vmul.f32 0.35355338, %v940_v34  ;;  %v1829_v36 = vpop.f32.mrb[5].mxu1 }
 0x272   : > { %v943_v37 = vpop.f32.mrb[6].mxu1 }
 0x273   : > { %v1830_v38 = vpop.f32.mrb[7].mxu1  ;;  %v947_v39 = vsel %vm787_vm3, %v946_v35, -inf }
 0x274   : > { %948 = vmax.xlane.f32.xlu0 %v947_v39 }
 0x278   : > { %v1051_v40 = vpop.f32.mrb[8].mxu1 }
 0x279   : > { %v1057_v41 = vmul.f32 0.35355338, %v1051_v40  ;;  %v1841_v42 = vpop.f32.mrb[9].mxu1 }
 0x27a   : > { %v1054_v43 = vpop.f32.mrb[10].mxu1  ;;  %v707_v42 = vld [vmem:[%s2291_s13] sm:$0xff] }
 0x27b   : > { %v1842_v44 = vpop.f32.mrb[11].mxu1  ;;  %v1058_v45 = vsel %vm787_vm3, %v1057_v41, -inf  ;;  %v708_v43 = vld [vmem:[%s2291_s13 + $0x8] sm:$0xff] }
 0x27c   : > { %1059 = vmax.xlane.f32.xlu0 %v1058_v45  ;;  %v1247_v44 = vpack.c.bf16 %v708_v43, %v707_v42  ;;  %v709_v45 = vld [vmem:[%s2291_s13 + $0x10] sm:$0xff] }
 0x27e   : > { %1862 = vmatpush3.bf16.msra.mxu1 %v1247_v44 }
 0x27f   : > { %1863 = vmatprep.subr.bf16.mxu1 %v2102_v4 }
 0x280   : > { %v1162_v46 = vpop.f32.mrb[12].mxu1 }
 0x281   : > { %v1168_v47 = vmul.f32 0.35355338, %v1162_v46  ;;  %v1853_v48 = vpop.f32.mrb[13].mxu1  ;;  %v710_v46 = vld [vmem:[%s2291_s13 + $0x18] sm:$0xff] }
 0x282   : > { %v1165_v49 = vpop.f32.mrb[14].mxu1 }
 0x283   : > { %v1854_v50 = vpop.f32.mrb[15].mxu1  ;;  %v1169_v51 = vsel %vm787_vm3, %v1168_v47, -inf }
 0x284   : > { %1170 = vmax.xlane.f32.xlu1 %v1169_v51 }
 0x2f9   : > { %v837_v52 = vpop.xlane.xlu1 %836 }
 0x2fa   : > { %v838_v53 = vsub.f32 %v834_v29, %v837_v52 }
 0x2fc   : > { %v839_v54 = vmul.f32 1.442695, %v838_v53 }
 0x2fe   : > { %1986 = vpow2.f32 %v839_v54 }
 0x301   : > { %v949_v55 = vpop.xlane.xlu0 %948 }
 0x302   : > { %v950_v56 = vsub.f32 %v946_v35, %v949_v55 }
 0x304   : > { %v951_v57 = vmul.f32 1.442695, %v950_v56 }
 0x306   : > { %1988 = vpow2.f32 %v951_v57 }
 0x308   : > { %v1987_v58 = vpop.eup %1986 }
 0x309   : > { %v1060_v59 = vpop.xlane.xlu0 %1059  ;;  %v841_v60 = vsel %vm787_vm3, %v1987_v58, 0.0 }
 0x30a   : > { %v1061_v61 = vsub.f32 %v1057_v41, %v1060_v59  ;;  %842 = vadd.xlane.f32.xlu0 %v841_v60 }
 0x30c   : > { %v1062_v62 = vmul.f32 1.442695, %v1061_v61 }
 0x30e   : > { %1990 = vpow2.f32 %v1062_v62 }
 0x310   : > { %v1989_v63 = vpop.eup %1988 }
 0x311   : > { %v953_v0 = vsel %vm787_vm3, %v1989_v63, 0.0  ;;  %v1171_v3 = vpop.xlane.xlu1 %1170 }
 0x312   : > { %954 = vadd.xlane.f32.xlu1 %v953_v0  ;;  %v1172_v5 = vsub.f32 %v1168_v47, %v1171_v3  ;;  %v1248_v47 = vpack.c.bf16 %v710_v46, %v709_v45 }
 0x314   : > { %v1173_v6 = vmul.f32 1.442695, %v1172_v5  ;;  %1864 = vmatpush3.bf16.msra.mxu1 %v1248_v47 }
 0x315   : > { %1877 = vmatprep.subr.bf16.mxu1 %v2102_v4 }
 0x316   : > { %1992 = vpow2.f32 %v1173_v6 }
 0x318   : > { %v1991_v1 = vpop.eup %1990 }
 0x319   : > { %v1064_v2 = vsel %vm787_vm3, %v1991_v1, 0.0 }
 0x31a   : > { %1065 = vadd.xlane.f32.xlu0 %v1064_v2 }
 0x320   : > { %v1993_v7 = vpop.eup %1992 }
 0x321   : > { %v1175_v9 = vsel %vm787_vm3, %v1993_v7, 0.0 }
 0x323   : > { %959 = vrot.lane.b32.xlu1 %v2357_v15, %s2111_s20 }
 0x330   : > { %847 = vrot.lane.b32.xlu0 %v2357_v15, %s2112_s24 }
 0x334   : > { %1181 = vrot.lane.b32.xlu0 %v2357_v15, %s2113_s15  ;;  %s2623_s15 = scalar_lea.vmem %s2568_s8, %s2275_s18 }
 0x347   : > { %1176 = vadd.xlane.f32.xlu1 %v1175_v9 }
 0x358   : > { %1070 = vrot.lane.b32.xlu1 %v2357_v15, %s2114_s14 }
 0x397   : > { %v843_v10 = vpop.xlane.xlu0 %842 }
 0x398   : > { %1994 = vrcp.f32 %v843_v10 }
 0x39f   : > { %v955_v11 = vpop.xlane.xlu1 %954 }
 0x3a0   : > { %1996 = vrcp.f32 %v955_v11 }
 0x3a2   : > { %v1995_v12 = vpop.eup %1994 }
 0x3a3   : > { %v845_v14 = vmul.f32 %v1995_v12, %v1987_v58  ;;  %v960_v18 = vpop.permute.xlu1 %959 }
 0x3a4   : > { %v965_v21 = vsel %vm852_vm4, %v960_v18, 0  ;;  %v717_v18 = vld [vmem:[%s2308_s25 + $0x18] sm:$0xff] }
 0x3a5   : > { %v846_v19 = vpack.c.bf16 %v845_v14, %v845_v14  ;;  %v714_v14 = vld [vmem:[%s2308_s25] sm:$0xff] }
 0x3a7   : > { %v1066_v13 = vpop.xlane.xlu0 %1065 }
 0x3a8   : > { %1998 = vrcp.f32 %v1066_v13 }
 0x3aa   : > { %v1997_v20 = vpop.eup %1996 }
 0x3ab   : > { %v848_v16 = vpop.permute.xlu0 %847  ;;  %v957_v15 = vmul.f32 %v1997_v20, %v1989_v63  ;;  %v1753_v63 = vld [vmem:[%s2620_s28] ss:$0 sm:$0xff] }
 0x3ac   : > { %v854_v17 = vsel %vm852_vm4, %v848_v16, 0  ;;  %v715_v16 = vld [vmem:[%s2308_s25 + $0x8] sm:$0xff]  ;;  %v719_v20 = vld [vmem:[%s2322_s0] sm:$0xff] }
 0x3ad   : > { %1820 = vmatpush3.bf16.msra.mxu0 %v854_v17  ;;  %v958_v22 = vpack.c.bf16 %v957_v15, %v957_v15  ;;  %v1328_v17 = vpack.c.bf16 %v715_v16, %v714_v14  ;;  %v721_v15 = vld [vmem:[%s2322_s0 + $0x10] sm:$0xff]  ;;  %v1479_v14 = vld [vmem:[%s2627_s26 + $0x18] sm:$0xff] (!%p1763_p1) }
 0x3ae   : > { %1831 = vmatprep.subr.bf16.mxu0 %v2102_v4 }
 0x3af   : > { %v1182_v28 = vpop.permute.xlu0 %1181 }
 0x3b0   : > { %1822 = vmatmul.mubr.msk.bf16.vlgmr.msra.gmra.mrb[4].mxu0 %vm787_vm3, %v846_v19  ;;  %v1187_v30 = vsel %vm852_vm4, %v1182_v28, 0 }
 0x3b1   : > { %1832 = vmatpush3.bf16.msra.mxu0 %v965_v21  ;;  %1833 = vmatprep.mubr.msk.bf16.mxu0 %vm2103_vm1, %v2102_v4  ;;  %v720_v21 = vld [vmem:[%s2322_s0 + $0x8] sm:$0xff] }
 0x3b2   : > { %1843 = vmatprep.subr.bf16.mxu0 %v2102_v4  ;;  %v1999_v23 = vpop.eup %1998 }
 0x3b3   : > { %v1068_v25 = vmul.f32 %v1999_v23, %v1991_v1  ;;  %v722_v23 = vld [vmem:[%s2322_s0 + $0x18] sm:$0xff] }
 0x3b5   : > { %v1069_v29 = vpack.c.bf16 %v1068_v25, %v1068_v25 }
 0x3b8   : > { %1834 = vmatmul.mubr.msk.bf16.vlgmr.msra.gmra.mrb[8].mxu0 %vm787_vm3, %v958_v22  ;;  %v1381_v22 = vpack.c.bf16 %v720_v21, %v719_v20 }
 0x3b9   : > { %1845 = vmatprep.mubr.msk.bf16.mxu0 %vm2103_vm1, %v2102_v4 }
 0x3d4   : > { %v1177_v24 = vpop.xlane.xlu1 %1176 }
 0x3d5   : > { %2000 = vrcp.f32 %v1177_v24  ;;  %v1382_v24 = vpack.c.bf16 %v722_v23, %v721_v15 }
 0x3d8   : > { %v1071_v26 = vpop.permute.xlu1 %1070 }
 0x3d9   : > { %v1076_v27 = vsel %vm852_vm4, %v1071_v26, 0 }
 0x3da   : > { %1844 = vmatpush3.bf16.msra.mxu0 %v1076_v27 }
 0x3db   : > { %1855 = vmatprep.subr.bf16.mxu0 %v2102_v4 }
 0x3dd   : > { %1846 = vmatmul.mubr.msk.bf16.vlgmr.msra.gmra.mrb[12].mxu0 %vm787_vm3, %v1069_v29  ;;  %v1755_v29 = vld [vmem:[%s2621_s23] ss:$0 sm:$0xff] }
 0x3de   : > { %1856 = vmatpush3.bf16.msra.mxu0 %v1187_v30  ;;  %1857 = vmatprep.mubr.msk.bf16.mxu0 %vm2103_vm1, %v2102_v4 }
 0x3df   : > { %v2001_v31 = vpop.eup %2000  ;;  %1869 = vmatprep.subr.bf16.mxu0 %v2102_v4 }
 0x3e0   : > { %v1179_v32 = vmul.f32 %v2001_v31, %v1993_v7  ;;  %v1756_v31 = vld [vmem:[%s2622_s12] ss:$0 sm:$0xff] }
 0x3e2   : > { %v1180_v33 = vpack.c.bf16 %v1179_v32, %v1179_v32 }
 0x3e5   : > { %1858 = vmatmul.mubr.msk.bf16.vlgmr.msra.gmra.mrb[16].mxu0 %vm787_vm3, %v1180_v33 }
 0x3e6   : > { %1873 = vmatprep.mubr.msk.bf16.mxu0 %vm2103_vm1, %v2102_v4  ;;  %1870 = vmatpush3.bf16.msra.mxu0 %v1328_v17 }
 0x3e7   : > { %1871 = vmatprep.subr.bf16.mxu0 %v2102_v4 }
 0x483   : > { %v890_v34 = vpop.f32.mrb[4].mxu0 }
 0x484   : > { %v1823_v35 = vpop.f32.mrb[5].mxu0 }
 0x485   : > { %v893_v36 = vpop.f32.mrb[6].mxu0  ;;  %v723_v35 = vld [vmem:[%s2322_s0 + $0x20] sm:$0xff] }
 0x486   : > { %v1824_v37 = vpop.f32.mrb[7].mxu0  ;;  %v724_v36 = vld [vmem:[%s2322_s0 + $0x28] sm:$0xff] }
 0x487   : > { %v1383_v37 = vpack.c.bf16 %v724_v36, %v723_v35 }
 0x48b   : > { %v1001_v38 = vpop.f32.mrb[8].mxu0 }
 0x48c   : > { %1230 = vrot.lane.b32.xlu1 %v1001_v38, %s2115_s3  ;;  %v1835_v39 = vpop.f32.mrb[9].mxu0  ;;  %v725_v38 = vld [vmem:[%s2322_s0 + $0x30] sm:$0xff] }
 0x48d   : > { %v1004_v40 = vpop.f32.mrb[10].mxu0  ;;  %v726_v39 = vld [vmem:[%s2322_s0 + $0x38] sm:$0xff] }
 0x48e   : > { %v1836_v41 = vpop.f32.mrb[11].mxu0  ;;  %v1384_v40 = vpack.c.bf16 %v726_v39, %v725_v38 }
 0x48f   : > { %v1757_v41 = vld [vmem:[%s2623_s15] ss:$0 sm:$0xff]  ;;  %s2628_s15 = sld [smem:[#allocation24_spill]] (!%p1763_p1) }
 0x495   : > { %v1483_v23 = vld [vmem:[%s2628_s15] sm:$0x1] (!%p1763_p1) }
 0x4b0   : > { %v1112_v48 = vpop.f32.mrb[12].mxu0 }
 0x4b1   : > { %1234 = vrot.lane.b32.xlu0 %v1112_v48, %s2116_s30  ;;  %v1847_v49 = vpop.f32.mrb[13].mxu0 }
 0x4b2   : > { %v1115_v50 = vpop.f32.mrb[14].mxu0 }
 0x4b3   : > { %v1848_v51 = vpop.f32.mrb[15].mxu0 }
 0x4b8   : > { %v1223_v52 = vpop.f32.mrb[16].mxu0 }
 0x4b9   : > { %1238 = vrot.lane.b32.xlu1 %v1223_v52, %s2117_s16  ;;  %v1859_v53 = vpop.f32.mrb[17].mxu0 }
 0x4ba   : > { %v1226_v54 = vpop.f32.mrb[18].mxu0 }
 0x4bb   : > { %v1860_v55 = vpop.f32.mrb[19].mxu0 }
 0x4fe   : > { %v1231_v56 = vpop.permute.xlu1 %1230 }
 0x4ff   : > { %v1241_v58 = vsel %vm787_vm3, %v890_v34, %v1231_v56 }
 0x523   : > { %v1235_v57 = vpop.permute.xlu0 %1234 }
 0x524   : > { %v1243_v59 = vsel %vm1242_vm5, %v1241_v58, %v1235_v57 }
 0x52b   : > { %v1239_v60 = vpop.permute.xlu1 %1238 }
 0x52c   : > { %v1245_v61 = vsel %vm1244_vm6, %v1243_v59, %v1239_v60 }
 0x52d   : > { %v1246_v62 = vpack.c.bf16 %v1245_v61, %v1245_v61 }
 0x52f   : > { %1866 = vmatmul.mubr.msk.bf16.vlgmr.msra.gmra.mrb[16].mxu1 %vm739_vm2, %v1246_v62 }
 0x530   : > { %1885 = vmatprep.mubr.msk.bf16.mxu1 %vm2103_vm1, %v2102_v4  ;;  %1878 = vmatpush3.bf16.msra.mxu1 %v1381_v22 }
 0x531   : > { %1879 = vmatprep.subr.bf16.mxu1 %v2102_v4 }
 0x534   : > { %1880 = vmatpush3.bf16.msra.mxu1 %v1382_v24 }
 0x535   : > { %1881 = vmatprep.subr.bf16.mxu1 %v2102_v4 }
 0x538   : > { %1882 = vmatpush3.bf16.msra.mxu1 %v1383_v37 }
 0x539   : > { %1883 = vmatprep.subr.bf16.mxu1 %v2102_v4  ;;  %v1759_v4 = vld [vmem:[%s686_s29] ss:$0 sm:$0xff] }
 0x53c   : > { %1884 = vmatpush3.bf16.msra.mxu1 %v1384_v40 }
 0x602   : > { %v1292_v0 = vpop.f32.mrb[16].mxu1 }
 0x603   : > { %v1293_v1 = vadd.f32 %v1753_v63, %v1292_v0  ;;  %v1867_v2 = vpop.f32.mrb[17].mxu1 }
 0x604   : > { %v1295_v3 = vpop.f32.mrb[18].mxu1 }
 0x605   : > { %v1868_v5 = vpop.f32.mrb[19].mxu1  ;;  %v1298_v6 = vadd.f32 %v1293_v1, %v2343_v8  ;;  %v716_v8 = vld [vmem:[%s2308_s25 + $0x10] sm:$0xff]  ;;  %v1761_v1 = vld [vmem:[%s689_s1] ss:$0 sm:$0xff] }
 0x606   : > { %v1329_v19 = vpack.c.bf16 %v717_v18, %v716_v8  ;;  %v1762_v3 = vld [vmem:[%s692_s7] ss:$0 sm:$0xff] }
 0x607   : > { %v1299_v7 = vsel %vm739_vm2, %v1298_v6, 0.0 }
 0x608   : > { %1300 = vadd.xlane.f32.xlu0 %v1299_v7  ;;  %1872 = vmatpush3.bf16.msra.mxu0 %v1329_v19  ;;  %v1476_v7 = vld [vmem:[%s2626_s21] sm:$0xff] (!%p1763_p1) }
 0x695   : > { %v1301_v9 = vpop.xlane.xlu0 %1300 }
 0x696   : > { %v1303_v10 = vmul.f32 0.03125, %v1301_v9  ;;  %v1477_v9 = vld [vmem:[%s2627_s26 + $0x8] sm:$0xff] (!%p1763_p1) }
 0x698   : > { %v1304_v11 = vsub.f32 %v1298_v6, %v1303_v10  ;;  %v1478_v10 = vld [vmem:[%s2627_s26 + $0x10] sm:$0xff] (!%p1763_p1) }
 0x699   : > { %v1482_v17 = vpack.c.bf16 (!%p1763_p1), %v1479_v14, %v1478_v10 }
 0x69a   : > { %v1305_v12 = vmul.f32 %v1304_v11, %v1304_v11 }
 0x69c   : > { %v1306_v13 = vsel %vm739_vm2, %v1305_v12, 0.0  ;;  %v2118_v12 = vmov (!%p1763_p1), 0.0  }
 0x69d   : > { %1307 = vadd.xlane.f32.xlu1 %v1306_v13  ;;  %1889 = vmatprep.subr.bf16.mxu0 (!%p1763_p1), %v2118_v12  ;;  %v1481_v13 = vpack.c.bf16 (!%p1763_p1), %v1477_v9, %v1476_v7 }
 0x72a   : > { %v1308_v25 = vpop.xlane.xlu1 %1307 }
 0x72b   : > { %v1309_v26 = vmul.f32 0.03125, %v1308_v25 }
 0x72d   : > { %v1310_v27 = vadd.f32 1e-05, %v1309_v26 }
 0x72f   : > { %2002 = vrsqrt.f32 %v1310_v27 }
 0x739   : > { %v2003_v28 = vpop.eup %2002 }
 0x73a   : > { %v1312_v30 = vmul.f32 %v2003_v28, %v1304_v11 }
 0x73c   : > { %v1319_v32 = vmul.f32 %v1755_v29, %v1312_v30 }
 0x73e   : > { %v1326_v33 = vadd.f32 %v1756_v31, %v1319_v32 }
 0x740   : > { %v1327_v34 = vpack.c.bf16 %v1326_v33, %v1326_v33 }
 0x742   : > { %1874 = vmatmul.mubr.msk.bf16.vlgmr.msra.gmra.mrb[20].mxu0 %vm739_vm2, %v1327_v34 }
 0x743   : > { %1893 = vmatprep.mubr.msk.bf16.mxu0 (!%p1763_p1), %vm2119_vm8, %v2118_v12  ;;  %1890 = vmatpush3.bf16.msra.mxu0 (!%p1763_p1), %v1481_v13 }
 0x744   : > { %1891 = vmatprep.subr.bf16.mxu0 (!%p1763_p1), %v2118_v12 }
 0x747   : > { %1892 = vmatpush3.bf16.msra.mxu0 (!%p1763_p1), %v1482_v17 }
 0x815   : > { %v1373_v42 = vpop.f32.mrb[20].mxu0 }
 0x816   : > { %v1374_v43 = vadd.f32 %v1757_v41, %v1373_v42  ;;  %v1875_v44 = vpop.f32.mrb[21].mxu0 }
 0x817   : > { %v1376_v45 = vpop.f32.mrb[22].mxu0 }
 0x818   : > { %v1379_v46 = vmax.f32 %v1374_v43, 0.0  ;;  %v1876_v47 = vpop.f32.mrb[23].mxu0 }
 0x81a   : > { %v1380_v48 = vpack.c.bf16 %v1379_v46, %v1379_v46 }
 0x81c   : > { %1886 = vmatmul.mubr.msk.bf16.vlgmr.msra.gmra.mrb[20].mxu1 %vm1391_vm7, %v1380_v48 }
 0x8ef   : > { %v1429_v49 = vpop.f32.mrb[20].mxu1 }
 0x8f0   : > { %v1430_v50 = vadd.f32 %v1759_v4, %v1429_v49  ;;  %v1887_v51 = vpop.f32.mrb[21].mxu1 }
 0x8f1   : > { %v1432_v52 = vpop.f32.mrb[22].mxu1 }
 0x8f2   : > { %v1888_v53 = vpop.f32.mrb[23].mxu1  ;;  %v1435_v54 = vadd.f32 %v1430_v50, %v1326_v33 }
 0x8f4   : > { %v1436_v55 = vsel %vm739_vm2, %v1435_v54, 0.0 }
 0x8f5   : > { %1437 = vadd.xlane.f32.xlu0 %v1436_v55 }
 0x982   : > { %v1438_v56 = vpop.xlane.xlu0 %1437 }
 0x983   : > { %v1439_v57 = vmul.f32 0.03125, %v1438_v56 }
 0x985   : > { %v1440_v58 = vsub.f32 %v1435_v54, %v1439_v57 }
 0x987   : > { %v1441_v59 = vmul.f32 %v1440_v58, %v1440_v58 }
 0x989   : > { %v1442_v60 = vsel %vm739_vm2, %v1441_v59, 0.0 }
 0x98a   : > { %1443 = vadd.xlane.f32.xlu0 %v1442_v60 }
 0xa17   : > { %v1444_v61 = vpop.xlane.xlu0 %1443 }
 0xa18   : > { %v1445_v62 = vmul.f32 0.03125, %v1444_v61 }
 0xa1a   : > { %v1446_v63 = vadd.f32 1e-05, %v1445_v62 }
 0xa1c   : > { %2004 = vrsqrt.f32 %v1446_v63 }
 0xa26   : > { %v2005_v0 = vpop.eup %2004 }
 0xa27   : > { %v1448_v2 = vmul.f32 %v2005_v0, %v1440_v58  ;;  %1467 = sbr.rel (%p1763_p1) target bundleno = 2837 (0xb15), region = 88 }
 0xa29   : > { %v1455_v5 = vmul.f32 %v1761_v1, %v1448_v2 }
 0xa2b   : > { %v1462_v6 = vadd.f32 %v1762_v3, %v1455_v5 }
 0xa2d   : > { %1463 = vst.msk [vmem:[#allocation2] sm:$0xff] %vm739_vm2, %v1462_v6  ;;  %v1468_v11 = vsel (!%p1763_p1), %vm739_vm2, %v1462_v6, 0.0 }
 0xa2e   : > { %v1469_v16 = vrot.slane %v1468_v11, 4 }
 0xa30   : > { %v1470_v8 = vadd.f32 %v1469_v16, %v1468_v11 }
 0xa32   : > { %v1471_v18 = vrot.slane %v1470_v8, 2 }
 0xa34   : > { %v1472_v19 = vadd.f32 %v1471_v18, %v1470_v8 }
 0xa36   : > { %v1473_v20 = vrot.slane %v1472_v19, 1 }
 0xa38   : > { %v1474_v21 = vadd.f32 %v1473_v20, %v1472_v19 }
 0xa3a   : > { %v1475_v15 = vmul.f32 0.125, %v1474_v21 }
 0xa3c   : > { %v1480_v22 = vpack.c.bf16 %v1475_v15, %v1475_v15 }
 0xa3e   : > { %1894 = vmatmul.mubr.msk.bf16.vlgmr.msra.gmra.mrb[0].mxu0 %vm739_vm2, %v1480_v22 }
 0xb11   : > { %v1521_v24 = vpop.f32.mrb[0].mxu0 }
 0xb12   : > { %v1522_v25 = vadd.f32 %v1521_v24, %v1483_v23  ;;  %v1895_v26 = vpop.f32.mrb[1].mxu0 }
 0xb13   : > { %v1524_v27 = vpop.f32.mrb[2].mxu0 }
 0xb14   : > { %1528 = vst.msk [vmem:[%s2334_s22] sm:$0x1] %vm1527_vm9, %v1522_v25  ;;  %v1896_v28 = vpop.f32.mrb[3].mxu0 }
 0xb15 PF: > { %s2629_s14 = sld [smem:[#allocation9_spill]]  ;;  %s2631_s16 = sld [smem:[#allocation25_spill]] }
 0xb16   : > { %s1542_s27 = sshll.u32 %s2334_s22, 4  ;;  %s2632_s28 = sand.u32 1, %s2076_s19   ;;  %s1543_s27 = int_to_ptr.vmem [resolvable:$true] %s1542_s27 }
 0xb17   : > { %s1530_s25 = scalar_lea.sflag [#allocation4], %s2632_s28  ;;  %s2006_s21 = scalar_lea.vmem %s1543_s27, 16 }
 0xb18   : > { %p2007_p2 = scmp.ne.s32.totalorder %s1543_s27, %s2006_s21  ;;  %s2120_s23 = smov [#allocation3]  }
 0xb19   : > { %s2010_s17 = sshll.u32 %s2120_s23, 4  ;;  %s2011_s17 = int_to_ptr.vmem [resolvable:$false] %s2010_s17 }
 0xb1a   : > { %p2008_p4 = pnand %p2007_p2, %p2250_p3  ;;  %s2012_s1 = scalar_lea.vmem %s2011_s17, 32 }
 0xb1b   : > { %s1765_s0 = sshll.u32 %s2629_s14, 4  ;;  %p2013_p6 = scmp.lt.s32.totalorder %s1543_s27, %s2011_s17 }
 0xb1c   : > { %s2510_s13 = scalar_lea.hbm %s2631_s16, %s1765_s0  ;;  %p2009_p5 = pneg %p2008_p4 }
 0xb1d   : > { %p2014_p7 = scmp.lt.s32.totalorder %s2012_s1, %s2006_s21 }
 0xb1f   : > { %p2015_p8 = por %p2014_p7, %p2013_p6 }
 0xb21   : > { %p2016_p10 = pnand %p2015_p8, %p2009_p5 }
 0xb23   : > { %2019 = shalt.err (!%p2016_p10)
}
 0xb24   : > { %s2020_s22 = scalar_lea.hbm %s2510_s13, 16  ;;  %s2024_s18 = scalar_lea.hbm %s2631_s16, 32 }
 0xb25   : > { %p2021_p11 = scmp.ne.s32.totalorder %s2510_s13, %s2020_s22  ;;  %p2025_p0 = scmp.lt.u32.totalorder %s2510_s13, %s2631_s16 }
 0xb26   : > { %p2026_p1 = scmp.lt.u32.totalorder %s2024_s18, %s2020_s22  ;;  %p2028_p4 = scmp.lt.u32.totalorder %s2020_s22, %s2510_s13 }
 0xb27   : > { %p2022_p12 = pnand %p2021_p11, %p2250_p3 }
 0xb28   : > { %p2027_p2 = por %p2026_p1, %p2025_p0 }
 0xb29   : > { %p2023_p13 = pneg %p2022_p12 }
 0xb2a   : > { %p2029_p5 = por %p2028_p4, %p2027_p2 }
 0xb2c   : > { %p2030_p6 = pnand %p2029_p5, %p2023_p13 }
 0xb2e   : > { %2033 = shalt.err (!%p2030_p6)
}
 0xb2f   : > { %1897 = dma.vmem_to_hbm [thread:$0]  (%p2250_p3), %s1543_s27, 16, %s2510_s13, %s1530_s25  }
 0xb30 PF: > { %s2633_s15 = sld [smem:[#allocation12_spill]]  ;;  %s2634_s14 = sld [smem:[#allocation6_spill]] }
 0xb36   : > { %p1903_p7 = scmp.ge.s32.totalorder %s2633_s15, 2  ;;  %s1554_s29 = sand.u32 1, %s2634_s14  }
 0xb37   : > { %s1555_s30 = scalar_lea.sflag [#allocation4], %s1554_s29 }
 0xb38   : > { %p1900_p8 = pnand %p1903_p7, %p2260_p9 }
 0xb3a   : > { %2067 = dma.done.wait (!%p1900_p8), %s1555_s30, 16  }
 0xb3b   : > { %2069 = vsyncadd (!%p1900_p8), %s1555_s30, 4294967280  ;;  %s28_s25 = sadd.s32 1, %s2633_s15   ;;  %s2636_s28 = sld [smem:[#allocation7_spill]] }
 0xb3c   : > { %p25_p10 = scmp.ge.s32.totalorder %s28_s25, 6   ;;  %s2637_s20 = sld [smem:[#allocation17_spill]] }
 0xb3d   : > { %s2638_s21 = sld [smem:[#allocation10_spill]]  ;;  %s2639_s22 = sld [smem:[#allocation11_spill]] }
 0xb3e   : > { %s2640_s23 = sld [smem:[#allocation13_spill]]  ;;  %s2641_s24 = sld [smem:[#allocation15_spill]] }
 0xb3f   : > { %s2642_s18 = smov %s2076_s19  ;;  %27 = sbr.rel (!%p25_p10) target bundleno = 14 (0xe), region = 159 }
 0xb41   : > { %s2643_s19 = smov %s2636_s28 }
 0xb46   :  { %1559 = vsyncpa [#allocation4], 1 }
 0xb47   :  { %1561 = vsyncpa [#allocation4 + $0x1], 1 }

</bundles_post_ra>
